<compile_context>
chip_gen: v7x
topology: tpu7x:2x2x1
jax: 0.10.0
libtpu: 0.0.40
codegen_flags: <defaults>
</compile_context>

<pallas_src>
import functools

import jax
import jax.numpy as jnp
from jax.experimental import pallas as pl
from jax.experimental.pallas import tpu as pltpu


def _round_up(x, m):
    return ((x + m - 1) // m) * m


def _pick_row_tile(n, row_tile):
    """Return (n_pad, TR) with minimal row padding and TR | n_pad, TR % 8 == 0."""
    n8 = _round_up(max(n, 8), 8)
    if n8 <= row_tile:
        return n8, n8
    if n8 % row_tile == 0:
        return n8, row_tile
    # Try to avoid padding the (possibly large) hidden activation in HBM:
    # largest multiple of 8 <= row_tile that divides n8 (keep >=128 for MXU fill).
    tr = (row_tile // 8) * 8
    while tr >= 128 and n8 % tr:
        tr -= 8
    if tr >= 128 and n8 % tr == 0:
        return n8, tr
    # Fall back to padding rows up to a multiple of row_tile.
    return _round_up(n8, row_tile), row_tile


# ----------------------------------------------------------------------------
# Kernel 1: fused LM head + cross-entropy (ignore_index=1), online LSE over V.
#   grid = (vocab_tiles OUTER, row_tiles INNER)  -> W streamed from HBM once.
#   Per-row-tile (m, l, target-logit) accumulators persist in VMEM scratch.
#   Output: per-row-tile (loss_sum, count) in a lane-dense (1, 8, 128) slab,
#   written on the last vocab tile.
# ----------------------------------------------------------------------------
def _lmhead_ce_kernel(h_ref, w_ref, b_ref, tgt_ref, out_ref,
                      m_sc, l_sc, t_sc, *, v_real, masked):
    j = pl.program_id(0)          # vocab tile (outer)
    i = pl.program_id(1)          # row tile (inner)
    tr = h_ref.shape[0]

    @pl.when(j == 0)
    def _():
        m_sc[i] = jnp.full((tr, 1), -jnp.inf, jnp.float32)
        l_sc[i] = jnp.zeros((tr, 1), jnp.float32)
        t_sc[i] = jnp.zeros((tr, 1), jnp.float32)

    # bf16 operands, f32 accumulation on the MXU.
    logits = (jnp.dot(h_ref[...], w_ref[...],
                      preferred_element_type=jnp.float32) + b_ref[...])
    tv = logits.shape[1]
    tgt = tgt_ref[...]                                    # (TR, 1) i32

    lane = jax.lax.broadcasted_iota(jnp.int32, (tr, tv), 1)
    if masked:
        # Padded vocab columns -> very negative so exp()->0 and max unaffected.
        logits = jnp.where(lane + j * tv < v_real, logits, jnp.float32(-1e30))

    # Target-logit gather restricted to this vocab tile (tile-local ids).
    tgt_local = tgt - j * tv                              # (TR, 1) i32
    t_sc[i] = t_sc[i] + jnp.sum(jnp.where(lane == tgt_local, logits, 0.0),
                                axis=-1, keepdims=True)

    # Online log-sum-exp.
    m_prev = m_sc[i]
    m_new = jnp.maximum(m_prev, jnp.max(logits, axis=-1, keepdims=True))
    l_sc[i] = (l_sc[i] * jnp.exp(m_prev - m_new)
               + jnp.sum(jnp.exp(logits - m_new), axis=-1, keepdims=True))
    m_sc[i] = m_new

    @pl.when(j == pl.num_programs(0) - 1)
    def _():
        per_tok = (m_sc[i] + jnp.log(l_sc[i])) - t_sc[i]   # (TR, 1)
        valid = (tgt != 1).astype(jnp.float32)             # ignore_index=1
        loss_sum = jnp.sum(per_tok * valid)
        cnt = jnp.sum(valid)
        row = jax.lax.broadcasted_iota(jnp.int32, (8, 128), 0)
        col = jax.lax.broadcasted_iota(jnp.int32, (8, 128), 1)
        slab = jnp.where((row == 0) & (col == 0), loss_sum,
                         jnp.where((row == 0) & (col == 1), cnt, 0.0))
        out_ref[...] = slab.reshape(1, 8, 128)


def fused_lm_head_ce(hidden_bf16, targets, w_lm_bf16, b_lm,
                     *, row_tile=512, vocab_tile=2048):
    """Mean CE over non-pad (!=1) targets of softmax(hidden @ W + b)."""
    N, H = hidden_bf16.shape
    V = w_lm_bf16.shape[1]

    # --- row tiling (avoid padding the hidden tensor whenever possible) ---
    n_pad, TR = _pick_row_tile(N, row_tile)
    if n_pad != N:
        hidden_bf16 = jnp.pad(hidden_bf16, ((0, n_pad - N), (0, 0)))
        targets = jnp.pad(targets, ((0, n_pad - N),), constant_values=1)
    G_rows = n_pad // TR

    # --- vocab tiling (pad V up to a multiple of TV; mask pads in-kernel) ---
    TV = min(vocab_tile, _round_up(V, 128))
    V_pad = _round_up(V, TV)
    if V_pad != V:
        w_lm_bf16 = jnp.pad(w_lm_bf16, ((0, 0), (0, V_pad - V)))
        b_lm = jnp.pad(b_lm, ((0, 0), (0, V_pad - V)))
    G_v = V_pad // TV

    tgt2d = targets.reshape(n_pad, 1).astype(jnp.int32)

    # Explicit VMEM budget (double-buffered blocks + accumulators + temps),
    # capped at 64 MiB so the limit is valid on v7x as well as v5e/v6e.
    est = (2 * (H * TV * 2 + TR * H * 2 + TV * 4 + 8 * 128 * 4)
           + 3 * G_rows * TR * 128 * 4           # lane-padded accumulators
           + 4 * TR * TV * 4)                    # logits / exp temporaries
    vmem_limit = int(min(max(2 * est, 32 * 1024 * 1024), 64 * 1024 * 1024))

    kernel = functools.partial(_lmhead_ce_kernel,
                               v_real=V, masked=(V_pad != V))

    partials = pl.pallas_call(
        kernel,
        out_shape=jax.ShapeDtypeStruct((G_rows, 8, 128), jnp.float32),
        grid_spec=pltpu.PrefetchScalarGridSpec(
            num_scalar_prefetch=0,
            grid=(G_v, G_rows),        # vocab OUTER: W fetched once per tile j
            in_specs=[
                pl.BlockSpec((TR, H), lambda j, i: (i, 0)),
                pl.BlockSpec((H, TV), lambda j, i: (0, j)),
                pl.BlockSpec((1, TV), lambda j, i: (0, j)),
                pl.BlockSpec((TR, 1), lambda j, i: (i, 0)),
            ],
            out_specs=pl.BlockSpec((1, 8, 128), lambda j, i: (i, 0, 0)),
            scratch_shapes=[
                pltpu.VMEM((G_rows, TR, 1), jnp.float32),   # running max
                pltpu.VMEM((G_rows, TR, 1), jnp.float32),   # running sum-exp
                pltpu.VMEM((G_rows, TR, 1), jnp.float32),   # target logit
            ],
        ),
        compiler_params=pltpu.CompilerParams(
            dimension_semantics=("arbitrary", "arbitrary"),
            vmem_limit_bytes=vmem_limit),
    )(hidden_bf16, w_lm_bf16, b_lm, tgt2d)

    sums = jnp.sum(partials[:, 0, :2], axis=0)   # [loss_sum, count]
    return sums[0] / sums[1]   # matches torch: NaN if every target == 1


# ----------------------------------------------------------------------------
# Kernel 2: fused prediction heads — single lane-dense (H, 128) matmul.
#   columns: [0] overall(sigmoid) | [1:11] confidence | [11:21] rating(sigmoid)
# ----------------------------------------------------------------------------
def _heads_kernel(cls_ref, w_ref, b_ref, o_ref):
    y = (jnp.dot(cls_ref[...], w_ref[...], preferred_element_type=jnp.float32)
         + b_ref[...])                                    # (Bp, 128) f32
    lane = jax.lax.broadcasted_iota(jnp.int32, y.shape, 1)
    sig_mask = (lane == 0) | ((lane >= 11) & (lane <= 20))
    o_ref[...] = jnp.where(sig_mask, jax.nn.sigmoid(y), y)


def prediction_heads(cls_bf16, w_heads_bf16, b_heads):
    B, H = cls_bf16.shape
    Bp = _round_up(max(B, 8), 8)          # sublane-aligned -> unmasked stores
    if Bp != B:
        cls_bf16 = jnp.pad(cls_bf16, ((0, Bp - B), (0, 0)))
    out = pl.pallas_call(
        _heads_kernel,
        out_shape=jax.ShapeDtypeStruct((Bp, 128), jnp.float32),
        grid=(1,),
        in_specs=[
            pl.BlockSpec((Bp, H), lambda i: (0, 0)),
            pl.BlockSpec((H, 128), lambda i: (0, 0)),
            pl.BlockSpec((1, 128), lambda i: (0, 0)),
        ],
        out_specs=pl.BlockSpec((Bp, 128), lambda i: (0, 0)),
    )(cls_bf16, w_heads_bf16, b_heads)
    return out[:B, 0:1], out[:B, 1:11], out[:B, 11:21]


# ----------------------------------------------------------------------------
# Plain-JAX glue (matches the torch module's forward semantics)
# ----------------------------------------------------------------------------
def shift_tokens_right(input_ids, pad_token_id):
    """Same semantics as modeling_bart.py shift_tokens_right."""
    index_of_eos = jnp.sum(input_ids != pad_token_id, axis=1) - 1      # (B,)
    first = jnp.take_along_axis(input_ids, index_of_eos[:, None], axis=1)
    return jnp.concatenate([first, input_ids[:, :-1]], axis=1)


def model_forward(params, input_ids, attention_masks, trg_input_ids=None):
    B = input_ids.shape[0]
    if trg_input_ids is None:
        trg_input_ids = jnp.zeros((B, 1), jnp.int32)
    decoder_input_ids = shift_tokens_right(trg_input_ids, 1)

    # global attention mask (constructed for fidelity; unused by the stand-in)
    global_attention_mask = jnp.zeros_like(input_ids).at[:, 0].set(1)
    del attention_masks, global_attention_mask

    # --- synthetic LED backbone stand-in (deterministic embedding lookup) ---
    emb = params["emb"]                                   # (V, H) f32
    encoder_last_hidden_state = emb[input_ids]            # (B, S, H)
    dec_hidden = emb[decoder_input_ids]                   # (B, Td, H)

    # fused LM head + generation loss (Pallas, no (N, V) logits in HBM)
    Bd, Td, H = dec_hidden.shape
    gen_loss = fused_lm_head_ce(
        dec_hidden.reshape(Bd * Td, H).astype(jnp.bfloat16),
        trg_input_ids.reshape(-1),
        params["w_lm"], params["b_lm"])

    # fused prediction heads on CLS token (Pallas, lane-dense output)
    cls = encoder_last_hidden_state[:, 0, :].astype(jnp.bfloat16)
    overall, aspect_conf, aspect_score = prediction_heads(
        cls, params["w_heads"], params["b_heads"])
    return overall, aspect_conf, aspect_score, gen_loss


# ----------------------------------------------------------------------------
# Deterministic parameter / input construction
# ----------------------------------------------------------------------------
def make_params(key, hidden=768, vocab=512):
    ks = jax.random.split(key, 6)
    s = 0.02
    w_score = jax.random.normal(ks[2], (hidden, 1), jnp.float32) * s
    w_conf = jax.random.normal(ks[3], (hidden, 10), jnp.float32) * s
    w_rate = jax.random.normal(ks[4], (hidden, 10), jnp.float32) * s
    # fused + lane-padded head weight (H, 128): [score | conf | rate | zeros]
    w_heads = jnp.zeros((hidden, 128), jnp.float32)
    w_heads = w_heads.at[:, 0:1].set(w_score)
    w_heads = w_heads.at[:, 1:11].set(w_conf)
    w_heads = w_heads.at[:, 11:21].set(w_rate)
    return {
        "emb":     jax.random.normal(ks[0], (vocab, hidden), jnp.float32) * s,
        "w_lm":    (jax.random.normal(ks[1], (hidden, vocab), jnp.float32)
                    * s).astype(jnp.bfloat16),
        "b_lm":    jnp.zeros((1, vocab), jnp.float32),
        "w_heads": w_heads.astype(jnp.bfloat16),
        "b_heads": jnp.zeros((1, 128), jnp.float32),
    }


def _reference_forward(params, input_ids, trg_input_ids):
    """Pure-JAX reference (same bf16 operand cast) for a sanity check."""
    decoder_input_ids = shift_tokens_right(trg_input_ids, 1)
    emb = params["emb"]
    enc = emb[input_ids]
    dec = emb[decoder_input_ids]
    B, Td, H = dec.shape
    h = dec.reshape(B * Td, H).astype(jnp.bfloat16)
    logits = jnp.dot(h, params["w_lm"],
                     preferred_element_type=jnp.float32) + params["b_lm"]
    tgt = trg_input_ids.reshape(-1)
    lse = jax.scipy.special.logsumexp(logits, axis=-1)
    tgt_logit = jnp.take_along_axis(logits, tgt[:, None], axis=1)[:, 0]
    per_tok = lse - tgt_logit
    valid = (tgt != 1).astype(jnp.float32)
    loss = jnp.sum(per_tok * valid) / jnp.sum(valid)
    cls = enc[:, 0, :].astype(jnp.bfloat16)
    y = jnp.dot(cls, params["w_heads"],
                preferred_element_type=jnp.float32) + params["b_heads"]
    return (jax.nn.sigmoid(y[:, 0:1]), y[:, 1:11],
            jax.nn.sigmoid(y[:, 11:21]), loss)


if __name__ == "__main__":
    B, S, Td, H, V = 2, 16, 8, 768, 512
    key = jax.random.PRNGKey(0)
    k_p, k_in, k_trg = jax.random.split(key, 3)

    params = make_params(k_p, hidden=H, vocab=V)

    input_ids = jax.random.randint(k_in, (B, S), 2, V, dtype=jnp.int32)
    attention_masks = jnp.ones((B, S), jnp.int32)
    trg_input_ids = jax.random.randint(k_trg, (B, Td), 2, V, dtype=jnp.int32)
    # put a couple of pad tokens (id=1) at the end of row 1 to exercise
    # ignore_index and the eos-wrap in shift_tokens_right
    trg_input_ids = trg_input_ids.at[1, -2:].set(1)

    fwd = jax.jit(functools.partial(model_forward, params))
    overall, aspect_conf, aspect_score, gen_loss = fwd(
        input_ids, attention_masks, trg_input_ids)
    jax.block_until_ready((overall, aspect_conf, aspect_score, gen_loss))

    assert overall.shape == (B, 1)
    assert aspect_conf.shape == (B, 10)
    assert aspect_score.shape == (B, 10)
    assert gen_loss.shape == ()
    assert bool(jnp.isfinite(gen_loss))

    # sanity check against a pure-JAX reference
    r_overall, r_conf, r_rate, r_loss = _reference_forward(
        params, input_ids, trg_input_ids)
    assert bool(jnp.allclose(overall, r_overall, rtol=2e-2, atol=2e-2))
    assert bool(jnp.allclose(aspect_conf, r_conf, rtol=2e-2, atol=2e-2))
    assert bool(jnp.allclose(aspect_score, r_rate, rtol=2e-2, atol=2e-2))
    assert bool(jnp.allclose(gen_loss, r_loss, rtol=2e-2, atol=2e-2))

    print("KERNEL_OK")
</pallas_src>

<mosaic_0001>
module attributes {stable_mosaic.version = 11 : i64} {
  func.func @_lmhead_ce_kernel(%arg0: i32, %arg1: i32, %arg2: memref<16x768xbf16, #tpu.memory_space<vmem>>, %arg3: memref<768x512xbf16, #tpu.memory_space<vmem>>, %arg4: memref<1x512xf32, #tpu.memory_space<vmem>>, %arg5: memref<16x1xi32, #tpu.memory_space<vmem>>, %arg6: memref<1x8x128xf32, #tpu.memory_space<vmem>>, %arg7: memref<1x16x1xf32, #tpu.memory_space<vmem>>, %arg8: memref<1x16x1xf32, #tpu.memory_space<vmem>>, %arg9: memref<1x16x1xf32, #tpu.memory_space<vmem>>) attributes {dimension_semantics = [#tpu.dimension_semantics<arbitrary>, #tpu.dimension_semantics<arbitrary>], iteration_bounds = array<i64: 1, 1>, scalar_prefetch = 0 : i64, scratch_operands = 3 : i64, tpu.core_type = #tpu.core_type<tc>, window_params = [{transform_indices = @transform_0, window_bounds = array<i64: 16, 768>}, {transform_indices = @transform_1, window_bounds = array<i64: 768, 512>}, {transform_indices = @transform_2, window_bounds = array<i64: 1, 512>}, {transform_indices = @transform_3, window_bounds = array<i64: 16, 1>}, {transform_indices = @transform_4, window_bounds = array<i64: 1, 8, 128>}]} {
    %c0_i32 = arith.constant 0 : i32
    %0 = arith.cmpi eq, %arg0, %c0_i32 : i32
    %1 = arith.extui %0 : i1 to i32
    %c0_i32_0 = arith.constant 0 : i32
    %2 = arith.cmpi ne, %1, %c0_i32_0 : i32
    scf.if %2 {
      %cst_26 = arith.constant 0xFF800000 : f32
      %57 = vector.broadcast %cst_26 : f32 to vector<16x1xf32>
      %58 = arith.index_cast %arg1 : i32 to index
      %c0_27 = arith.constant 0 : index
      %c0_28 = arith.constant 0 : index
      %59 = vector.load %arg7[%58, %c0_27, %c0_28] : memref<1x16x1xf32, #tpu.memory_space<vmem>>, vector<1x16x1xf32>
      %60 = vector.shape_cast %59 : vector<1x16x1xf32> to vector<16x1xf32>
      %61 = vector.shape_cast %57 : vector<16x1xf32> to vector<1x16x1xf32>
      tpu.vector_store %arg7[%58, %c0_27, %c0_28], %61 {strides = array<i32>} : memref<1x16x1xf32, #tpu.memory_space<vmem>>, vector<1x16x1xf32>,
      %cst_29 = arith.constant 0.000000e+00 : f32
      %62 = vector.broadcast %cst_29 : f32 to vector<16x1xf32>
      %63 = arith.index_cast %arg1 : i32 to index
      %c0_30 = arith.constant 0 : index
      %c0_31 = arith.constant 0 : index
      %64 = vector.load %arg8[%63, %c0_30, %c0_31] : memref<1x16x1xf32, #tpu.memory_space<vmem>>, vector<1x16x1xf32>
      %65 = vector.shape_cast %64 : vector<1x16x1xf32> to vector<16x1xf32>
      %66 = vector.shape_cast %62 : vector<16x1xf32> to vector<1x16x1xf32>
      tpu.vector_store %arg8[%63, %c0_30, %c0_31], %66 {strides = array<i32>} : memref<1x16x1xf32, #tpu.memory_space<vmem>>, vector<1x16x1xf32>,
      %cst_32 = arith.constant 0.000000e+00 : f32
      %67 = vector.broadcast %cst_32 : f32 to vector<16x1xf32>
      %68 = arith.index_cast %arg1 : i32 to index
      %c0_33 = arith.constant 0 : index
      %c0_34 = arith.constant 0 : index
      %69 = vector.load %arg9[%68, %c0_33, %c0_34] : memref<1x16x1xf32, #tpu.memory_space<vmem>>, vector<1x16x1xf32>
      %70 = vector.shape_cast %69 : vector<1x16x1xf32> to vector<16x1xf32>
      %71 = vector.shape_cast %67 : vector<16x1xf32> to vector<1x16x1xf32>
      tpu.vector_store %arg9[%68, %c0_33, %c0_34], %71 {strides = array<i32>} : memref<1x16x1xf32, #tpu.memory_space<vmem>>, vector<1x16x1xf32>,
    } else {
    }
    %c0 = arith.constant 0 : index
    %c0_1 = arith.constant 0 : index
    %3 = vector.load %arg2[%c0, %c0_1] : memref<16x768xbf16, #tpu.memory_space<vmem>>, vector<16x768xbf16>
    %c0_2 = arith.constant 0 : index
    %c0_3 = arith.constant 0 : index
    %4 = vector.load %arg3[%c0_2, %c0_3] : memref<768x512xbf16, #tpu.memory_space<vmem>>, vector<768x512xbf16>
    %cst = arith.constant dense<0.000000e+00> : vector<16x512xf32>
    %5 = tpu.matmul %3, %4, %cst {dimension_numbers = #tpu.dot_dimension_numbers<[1], [0], [0], [1], [0, 0, 1, 1], [], []>} : vector<16x768xbf16>, vector<768x512xbf16>, vector<16x512xf32> -> vector<16x512xf32>
    %c0_4 = arith.constant 0 : index
    %c0_5 = arith.constant 0 : index
    %6 = vector.load %arg4[%c0_4, %c0_5] : memref<1x512xf32, #tpu.memory_space<vmem>>, vector<1x512xf32>
    %7 = vector.broadcast %6 : vector<1x512xf32> to vector<16x512xf32>
    %8 = arith.addf %5, %7 : vector<16x512xf32>
    %c0_6 = arith.constant 0 : index
    %c0_7 = arith.constant 0 : index
    %9 = vector.load %arg5[%c0_6, %c0_7] : memref<16x1xi32, #tpu.memory_space<vmem>>, vector<16x1xi32>
    %10 = tpu.iota {dimensions = array<i32: 1>} : vector<16x512xi32>
    %c512_i32 = arith.constant 512 : i32
    %11 = arith.muli %arg0, %c512_i32 : i32
    %12 = vector.broadcast %11 : i32 to vector<16x1xi32>
    %13 = arith.subi %9, %12 : vector<16x1xi32>
    %14 = arith.index_cast %arg1 : i32 to index
    %c0_8 = arith.constant 0 : index
    %c0_9 = arith.constant 0 : index
    %15 = vector.load %arg9[%14, %c0_8, %c0_9] : memref<1x16x1xf32, #tpu.memory_space<vmem>>, vector<1x16x1xf32>
    %16 = vector.shape_cast %15 : vector<1x16x1xf32> to vector<16x1xf32>
    %17 = vector.broadcast %13 : vector<16x1xi32> to vector<16x512xi32>
    %18 = arith.cmpi eq, %10, %17 : vector<16x512xi32>
    %cst_10 = arith.constant 0.000000e+00 : f32
    %19 = vector.broadcast %cst_10 : f32 to vector<16x512xf32>
    %20 = arith.select %18, %8, %19 : vector<16x512xi1>, vector<16x512xf32>
    %cst_11 = arith.constant dense<0.000000e+00> : vector<16xf32>
    %21 = vector.multi_reduction <add>, %20, %cst_11 [1] : vector<16x512xf32> to vector<16xf32>
    %22 = vector.shape_cast %21 : vector<16xf32> to vector<16x1xf32>
    %23 = arith.addf %16, %22 : vector<16x1xf32>
    %24 = arith.index_cast %arg1 : i32 to index
    %c0_12 = arith.constant 0 : index
    %c0_13 = arith.constant 0 : index
    %25 = vector.load %arg9[%24, %c0_12, %c0_13] : memref<1x16x1xf32, #tpu.memory_space<vmem>>, vector<1x16x1xf32>
    %26 = vector.shape_cast %25 : vector<1x16x1xf32> to vector<16x1xf32>
    %27 = vector.shape_cast %23 : vector<16x1xf32> to vector<1x16x1xf32>
    tpu.vector_store %arg9[%24, %c0_12, %c0_13], %27 {strides = array<i32>} : memref<1x16x1xf32, #tpu.memory_space<vmem>>, vector<1x16x1xf32>,
    %28 = arith.index_cast %arg1 : i32 to index
    %c0_14 = arith.constant 0 : index
    %c0_15 = arith.constant 0 : index
    %29 = vector.load %arg7[%28, %c0_14, %c0_15] : memref<1x16x1xf32, #tpu.memory_space<vmem>>, vector<1x16x1xf32>
    %30 = vector.shape_cast %29 : vector<1x16x1xf32> to vector<16x1xf32>
    %cst_16 = arith.constant dense<0xFF800000> : vector<16xf32>
    %31 = vector.multi_reduction <maximumf>, %8, %cst_16 [1] : vector<16x512xf32> to vector<16xf32>
    %32 = vector.shape_cast %31 : vector<16xf32> to vector<16x1xf32>
    %33 = arith.maximumf %30, %32 : vector<16x1xf32>
    %34 = arith.index_cast %arg1 : i32 to index
    %c0_17 = arith.constant 0 : index
    %c0_18 = arith.constant 0 : index
    %35 = vector.load %arg8[%34, %c0_17, %c0_18] : memref<1x16x1xf32, #tpu.memory_space<vmem>>, vector<1x16x1xf32>
    %36 = vector.shape_cast %35 : vector<1x16x1xf32> to vector<16x1xf32>
    %37 = arith.subf %30, %33 : vector<16x1xf32>
    %38 = math.exp %37 : vector<16x1xf32>
    %39 = arith.mulf %36, %38 : vector<16x1xf32>
    %40 = vector.broadcast %33 : vector<16x1xf32> to vector<16x512xf32>
    %41 = arith.subf %8, %40 : vector<16x512xf32>
    %42 = math.exp %41 : vector<16x512xf32>
    %cst_19 = arith.constant dense<0.000000e+00> : vector<16xf32>
    %43 = vector.multi_reduction <add>, %42, %cst_19 [1] : vector<16x512xf32> to vector<16xf32>
    %44 = vector.shape_cast %43 : vector<16xf32> to vector<16x1xf32>
    %45 = arith.addf %39, %44 : vector<16x1xf32>
    %46 = arith.index_cast %arg1 : i32 to index
    %c0_20 = arith.constant 0 : index
    %c0_21 = arith.constant 0 : index
    %47 = vector.load %arg8[%46, %c0_20, %c0_21] : memref<1x16x1xf32, #tpu.memory_space<vmem>>, vector<1x16x1xf32>
    %48 = vector.shape_cast %47 : vector<1x16x1xf32> to vector<16x1xf32>
    %49 = vector.shape_cast %45 : vector<16x1xf32> to vector<1x16x1xf32>
    tpu.vector_store %arg8[%46, %c0_20, %c0_21], %49 {strides = array<i32>} : memref<1x16x1xf32, #tpu.memory_space<vmem>>, vector<1x16x1xf32>,
    %50 = arith.index_cast %arg1 : i32 to index
    %c0_22 = arith.constant 0 : index
    %c0_23 = arith.constant 0 : index
    %51 = vector.load %arg7[%50, %c0_22, %c0_23] : memref<1x16x1xf32, #tpu.memory_space<vmem>>, vector<1x16x1xf32>
    %52 = vector.shape_cast %51 : vector<1x16x1xf32> to vector<16x1xf32>
    %53 = vector.shape_cast %33 : vector<16x1xf32> to vector<1x16x1xf32>
    tpu.vector_store %arg7[%50, %c0_22, %c0_23], %53 {strides = array<i32>} : memref<1x16x1xf32, #tpu.memory_space<vmem>>, vector<1x16x1xf32>,
    %c0_i32_24 = arith.constant 0 : i32
    %54 = arith.cmpi eq, %arg0, %c0_i32_24 : i32
    %55 = arith.extui %54 : i1 to i32
    %c0_i32_25 = arith.constant 0 : i32
    %56 = arith.cmpi ne, %55, %c0_i32_25 : i32
    scf.if %56 {
      %57 = arith.index_cast %arg1 : i32 to index
      %c0_26 = arith.constant 0 : index
      %c0_27 = arith.constant 0 : index
      %58 = vector.load %arg7[%57, %c0_26, %c0_27] : memref<1x16x1xf32, #tpu.memory_space<vmem>>, vector<1x16x1xf32>
      %59 = vector.shape_cast %58 : vector<1x16x1xf32> to vector<16x1xf32>
      %60 = arith.index_cast %arg1 : i32 to index
      %c0_28 = arith.constant 0 : index
      %c0_29 = arith.constant 0 : index
      %61 = vector.load %arg8[%60, %c0_28, %c0_29] : memref<1x16x1xf32, #tpu.memory_space<vmem>>, vector<1x16x1xf32>
      %62 = vector.shape_cast %61 : vector<1x16x1xf32> to vector<16x1xf32>
      %63 = math.log %62 : vector<16x1xf32>
      %64 = arith.addf %59, %63 : vector<16x1xf32>
      %65 = arith.index_cast %arg1 : i32 to index
      %c0_30 = arith.constant 0 : index
      %c0_31 = arith.constant 0 : index
      %66 = vector.load %arg9[%65, %c0_30, %c0_31] : memref<1x16x1xf32, #tpu.memory_space<vmem>>, vector<1x16x1xf32>
      %67 = vector.shape_cast %66 : vector<1x16x1xf32> to vector<16x1xf32>
      %68 = arith.subf %64, %67 : vector<16x1xf32>
      %c1_i32 = arith.constant 1 : i32
      %69 = vector.broadcast %c1_i32 : i32 to vector<16x1xi32>
      %70 = arith.cmpi ne, %9, %69 : vector<16x1xi32>
      %71 = arith.extui %70 : vector<16x1xi1> to vector<16x1xi32>
      %72 = arith.sitofp %71 : vector<16x1xi32> to vector<16x1xf32>
      %73 = arith.mulf %68, %72 : vector<16x1xf32>
      %74 = vector.shape_cast %73 : vector<16x1xf32> to vector<1x16x1xf32>
      %cst_32 = arith.constant dense<0.000000e+00> : vector<1xf32>
      %75 = vector.multi_reduction <add>, %74, %cst_32 [1, 2] : vector<1x16x1xf32> to vector<1xf32>
      %76 = vector.shape_cast %75 : vector<1xf32> to vector<1x1x1xf32>
      %77 = vector.extract %76[0, 0, 0] : f32 from vector<1x1x1xf32>
      %78 = vector.shape_cast %72 : vector<16x1xf32> to vector<1x16x1xf32>
      %cst_33 = arith.constant dense<0.000000e+00> : vector<1xf32>
      %79 = vector.multi_reduction <add>, %78, %cst_33 [1, 2] : vector<1x16x1xf32> to vector<1xf32>
      %80 = vector.shape_cast %79 : vector<1xf32> to vector<1x1x1xf32>
      %81 = vector.extract %80[0, 0, 0] : f32 from vector<1x1x1xf32>
      %82 = tpu.iota {dimensions = array<i32: 0>} : vector<8x128xi32>
      %83 = tpu.iota {dimensions = array<i32: 1>} : vector<8x128xi32>
      %c0_i32_34 = arith.constant 0 : i32
      %84 = vector.broadcast %c0_i32_34 : i32 to vector<8x128xi32>
      %85 = arith.cmpi eq, %82, %84 : vector<8x128xi32>
      %c0_i32_35 = arith.constant 0 : i32
      %86 = vector.broadcast %c0_i32_35 : i32 to vector<8x128xi32>
      %87 = arith.cmpi eq, %83, %86 : vector<8x128xi32>
      %88 = arith.andi %85, %87 : vector<8x128xi1>
      %c0_i32_36 = arith.constant 0 : i32
      %89 = vector.broadcast %c0_i32_36 : i32 to vector<8x128xi32>
      %90 = arith.cmpi eq, %82, %89 : vector<8x128xi32>
      %c1_i32_37 = arith.constant 1 : i32
      %91 = vector.broadcast %c1_i32_37 : i32 to vector<8x128xi32>
      %92 = arith.cmpi eq, %83, %91 : vector<8x128xi32>
      %93 = arith.andi %90, %92 : vector<8x128xi1>
      %cst_38 = arith.constant 0.000000e+00 : f32
      %94 = vector.broadcast %81 : f32 to vector<8x128xf32>
      %95 = vector.broadcast %cst_38 : f32 to vector<8x128xf32>
      %96 = arith.select %93, %94, %95 : vector<8x128xi1>, vector<8x128xf32>
      %97 = vector.broadcast %77 : f32 to vector<8x128xf32>
      %98 = arith.select %88, %97, %96 : vector<8x128xi1>, vector<8x128xf32>
      %99 = vector.shape_cast %98 : vector<8x128xf32> to vector<1x8x128xf32>
      %c0_39 = arith.constant 0 : index
      %c0_40 = arith.constant 0 : index
      %c0_41 = arith.constant 0 : index
      %100 = vector.load %arg6[%c0_39, %c0_40, %c0_41] : memref<1x8x128xf32, #tpu.memory_space<vmem>>, vector<1x8x128xf32>
      tpu.vector_store %arg6[%c0_39, %c0_40, %c0_41], %99 {strides = array<i32>} : memref<1x8x128xf32, #tpu.memory_space<vmem>>, vector<1x8x128xf32>,
    } else {
    }
    return
  }
  func.func @transform_0(%arg0: i32, %arg1: i32) -> (i32, i32) {
    %c0_i32 = arith.constant 0 : i32
    %c0_i32_0 = arith.constant 0 : i32
    return %arg1, %c0_i32 : i32, i32
  }
  func.func @transform_1(%arg0: i32, %arg1: i32) -> (i32, i32) {
    %c0_i32 = arith.constant 0 : i32
    %c0_i32_0 = arith.constant 0 : i32
    return %c0_i32, %arg0 : i32, i32
  }
  func.func @transform_2(%arg0: i32, %arg1: i32) -> (i32, i32) {
    %c0_i32 = arith.constant 0 : i32
    %c0_i32_0 = arith.constant 0 : i32
    return %c0_i32, %arg0 : i32, i32
  }
  func.func @transform_3(%arg0: i32, %arg1: i32) -> (i32, i32) {
    %c0_i32 = arith.constant 0 : i32
    %c0_i32_0 = arith.constant 0 : i32
    return %arg1, %c0_i32 : i32, i32
  }
  func.func @transform_4(%arg0: i32, %arg1: i32) -> (i32, i32, i32) {
    %c0_i32 = arith.constant 0 : i32
    %c0_i32_0 = arith.constant 0 : i32
    %c0_i32_1 = arith.constant 0 : i32
    return %arg1, %c0_i32, %c0_i32_0 : i32, i32, i32
  }
}

module attributes {stable_mosaic.version = 11 : i64} {
  func.func @_heads_kernel(%arg0: i32, %arg1: memref<8x768xbf16, #tpu.memory_space<vmem>>, %arg2: memref<768x128xbf16, #tpu.memory_space<vmem>>, %arg3: memref<1x128xf32, #tpu.memory_space<vmem>>, %arg4: memref<8x128xf32, #tpu.memory_space<vmem>>) attributes {dimension_semantics = [#tpu.dimension_semantics<arbitrary>], iteration_bounds = array<i64: 1>, scalar_prefetch = 0 : i64, scratch_operands = 0 : i64, tpu.core_type = #tpu.core_type<tc>, window_params = [{pipeline_mode = #tpu.pipeline_mode<synchronous>, transform_indices = @transform_0, window_bounds = array<i64: 8, 768>}, {pipeline_mode = #tpu.pipeline_mode<synchronous>, transform_indices = @transform_1, window_bounds = array<i64: 768, 128>}, {pipeline_mode = #tpu.pipeline_mode<synchronous>, transform_indices = @transform_2, window_bounds = array<i64: 1, 128>}, {pipeline_mode = #tpu.pipeline_mode<synchronous>, transform_indices = @transform_3, window_bounds = array<i64: 8, 128>}]} {
    %c0 = arith.constant 0 : index
    %c0_0 = arith.constant 0 : index
    %0 = vector.load %arg1[%c0, %c0_0] : memref<8x768xbf16, #tpu.memory_space<vmem>>, vector<8x768xbf16>
    %c0_1 = arith.constant 0 : index
    %c0_2 = arith.constant 0 : index
    %1 = vector.load %arg2[%c0_1, %c0_2] : memref<768x128xbf16, #tpu.memory_space<vmem>>, vector<768x128xbf16>
    %cst = arith.constant dense<0.000000e+00> : vector<8x128xf32>
    %2 = tpu.matmul %0, %1, %cst {dimension_numbers = #tpu.dot_dimension_numbers<[1], [0], [0], [1], [0, 0, 1, 1], [], []>} : vector<8x768xbf16>, vector<768x128xbf16>, vector<8x128xf32> -> vector<8x128xf32>
    %c0_3 = arith.constant 0 : index
    %c0_4 = arith.constant 0 : index
    %3 = vector.load %arg3[%c0_3, %c0_4] : memref<1x128xf32, #tpu.memory_space<vmem>>, vector<1x128xf32>
    %4 = vector.broadcast %3 : vector<1x128xf32> to vector<8x128xf32>
    %5 = arith.addf %2, %4 : vector<8x128xf32>
    %6 = tpu.iota {dimensions = array<i32: 1>} : vector<8x128xi32>
    %c0_i32 = arith.constant 0 : i32
    %7 = vector.broadcast %c0_i32 : i32 to vector<8x128xi32>
    %8 = arith.cmpi eq, %6, %7 : vector<8x128xi32>
    %c11_i32 = arith.constant 11 : i32
    %9 = vector.broadcast %c11_i32 : i32 to vector<8x128xi32>
    %10 = arith.cmpi sge, %6, %9 : vector<8x128xi32>
    %c20_i32 = arith.constant 20 : i32
    %11 = vector.broadcast %c20_i32 : i32 to vector<8x128xi32>
    %12 = arith.cmpi sle, %6, %11 : vector<8x128xi32>
    %13 = arith.andi %10, %12 : vector<8x128xi1>
    %14 = arith.ori %8, %13 : vector<8x128xi1>
    %15 = arith.negf %5 : vector<8x128xf32>
    %16 = math.exp %15 : vector<8x128xf32>
    %cst_5 = arith.constant 1.000000e+00 : f32
    %17 = vector.broadcast %cst_5 : f32 to vector<8x128xf32>
    %18 = arith.addf %17, %16 : vector<8x128xf32>
    %19 = arith.divf %17, %18 : vector<8x128xf32>
    %20 = arith.select %14, %19, %5 : vector<8x128xi1>, vector<8x128xf32>
    %c0_6 = arith.constant 0 : index
    %c0_7 = arith.constant 0 : index
    %21 = vector.load %arg4[%c0_6, %c0_7] : memref<8x128xf32, #tpu.memory_space<vmem>>, vector<8x128xf32>
    tpu.vector_store %arg4[%c0_6, %c0_7], %20 {strides = array<i32>} : memref<8x128xf32, #tpu.memory_space<vmem>>, vector<8x128xf32>,
    return
  }
  func.func @transform_0(%arg0: i32) -> (i32, i32) {
    %c0_i32 = arith.constant 0 : i32
    %c0_i32_0 = arith.constant 0 : i32
    %c0_i32_1 = arith.constant 0 : i32
    return %c0_i32, %c0_i32_0 : i32, i32
  }
  func.func @transform_1(%arg0: i32) -> (i32, i32) {
    %c0_i32 = arith.constant 0 : i32
    %c0_i32_0 = arith.constant 0 : i32
    %c0_i32_1 = arith.constant 0 : i32
    return %c0_i32, %c0_i32_0 : i32, i32
  }
  func.func @transform_2(%arg0: i32) -> (i32, i32) {
    %c0_i32 = arith.constant 0 : i32
    %c0_i32_0 = arith.constant 0 : i32
    %c0_i32_1 = arith.constant 0 : i32
    return %c0_i32, %c0_i32_0 : i32, i32
  }
  func.func @transform_3(%arg0: i32) -> (i32, i32) {
    %c0_i32 = arith.constant 0 : i32
    %c0_i32_0 = arith.constant 0 : i32
    %c0_i32_1 = arith.constant 0 : i32
    return %c0_i32, %c0_i32_0 : i32, i32
  }
}

</mosaic_0001>

<bundles_post_ra>
// kernel: model_forward.3
= control target key start
LH: loop header
LB: loop body
LE: loop exit
PB: predicated region body
PF: predicated region fallthrough
CT: control target
= control target key end

     0   :  { %s928_s1 = inlined_call_operand.vmem [shape: bf16[768,128], index: 1, kind: input, shape index: {}]   ;;  %s929_s0 = inlined_call_operand.vmem [shape: bf16[8,768], index: 0, kind: input, shape index: {}]   ;;  %s930_s2 = inlined_call_operand.vmem [shape: f32[1,128], index: 2, kind: input, shape index: {}]   ;;  %s931_s3 = inlined_call_operand.vmem [shape: f32[8,128], index: 3, kind: output, shape index: {}]  }
   0x1   :  { %v691_v0 = vld [vmem:[%s928_s1 + $0x40] sm:$0xff]   ;;  %v695_v4 = vld [vmem:[%s928_s1 + $0x48] sm:$0xff]   ;;  %v699_v8 = vld [vmem:[%s928_s1 + $0x50] sm:$0xff]  }
   0x2   :  { %v692_v1 = vld [vmem:[%s928_s1] sm:$0xff]   ;;  %625 = vmatprep.subr.bf16.mxu0 %v691_v0  ;;  %v696_v5 = vld [vmem:[%s928_s1 + $0x8] sm:$0xff]   ;;  %v700_v9 = vld [vmem:[%s928_s1 + $0x10] sm:$0xff]  }
   0x3   :  { %v693_v2 = vld [vmem:[%s928_s1 + $0xc0] sm:$0xff]   ;;  %626 = vmatpush3.bf16.msra.mxu0 %v692_v1  ;;  %v697_v6 = vld [vmem:[%s928_s1 + $0xc8] sm:$0xff]   ;;  %v701_v10 = vld [vmem:[%s928_s1 + $0xd0] sm:$0xff]  }
   0x4   :  { %v694_v3 = vld [vmem:[%s928_s1 + $0x80] sm:$0xff]   ;;  %647 = vmatprep.subr.bf16.mxu1 %v693_v2  ;;  %627 = vmatprep.subr.bf16.mxu0 %v695_v4  ;;  %v698_v7 = vld [vmem:[%s928_s1 + $0x88] sm:$0xff]   ;;  %v702_v11 = vld [vmem:[%s928_s1 + $0x90] sm:$0xff]  }
   0x5   :  { %648 = vmatpush3.bf16.msra.mxu1 %v694_v3  ;;  %v703_v12 = vld [vmem:[%s928_s1 + $0x58] sm:$0xff]   ;;  %v707_v16 = vld [vmem:[%s928_s1 + $0x60] sm:$0xff]   ;;  %v711_v20 = vld [vmem:[%s928_s1 + $0x68] sm:$0xff]  }
   0x6   :  { %649 = vmatprep.subr.bf16.mxu1 %v697_v6  ;;  %v704_v13 = vld [vmem:[%s928_s1 + $0x18] sm:$0xff]   ;;  %v708_v17 = vld [vmem:[%s928_s1 + $0x20] sm:$0xff]   ;;  %v712_v21 = vld [vmem:[%s928_s1 + $0x28] sm:$0xff]  }
   0x7   :  { %628 = vmatpush3.bf16.msra.mxu0 %v696_v5  ;;  %v705_v14 = vld [vmem:[%s928_s1 + $0xd8] sm:$0xff]   ;;  %v709_v18 = vld [vmem:[%s928_s1 + $0xe0] sm:$0xff]   ;;  %v713_v22 = vld [vmem:[%s928_s1 + $0xe8] sm:$0xff]  }
   0x8   :  { %629 = vmatprep.subr.bf16.mxu0 %v699_v8  ;;  %v706_v15 = vld [vmem:[%s928_s1 + $0x98] sm:$0xff]   ;;  %v710_v19 = vld [vmem:[%s928_s1 + $0xa0] sm:$0xff]   ;;  %v714_v23 = vld [vmem:[%s928_s1 + $0xa8] sm:$0xff]  }
   0x9   :  { %650 = vmatpush3.bf16.msra.mxu1 %v698_v7  ;;  %v715_v24 = vld [vmem:[%s928_s1 + $0x70] sm:$0xff]   ;;  %v719_v28 = vld [vmem:[%s928_s1 + $0x78] sm:$0xff]   ;;  %v15_v31 = vld [vmem:[%s929_s0] sm:$0xff] }
   0xa   :  { %651 = vmatprep.subr.bf16.mxu1 %v701_v10  ;;  %v716_v25 = vld [vmem:[%s928_s1 + $0x30] sm:$0xff]   ;;  %v720_v29 = vld [vmem:[%s928_s1 + $0x38] sm:$0xff]   ;;  %v570_v32 = vcombine.low %v15_v31, %v15_v31  ;;  %v571_v33 = vcombine.high %v15_v31, %v15_v31  ;;  %v725_v35 = vld [vmem:[%s928_s1 + $0x140] sm:$0xff]  }
   0xb   :  { %630 = vmatpush3.bf16.msra.mxu0 %v700_v9  ;;  %v717_v26 = vld [vmem:[%s928_s1 + $0xf0] sm:$0xff]   ;;  %v721_v30 = vld [vmem:[%s928_s1 + $0xf8] sm:$0xff]   ;;  %v16_v36 = vld [vmem:[%s929_s0 + $0x8] sm:$0xff] }
   0xc   :  { %631 = vmatprep.subr.bf16.mxu0 %v703_v12  ;;  %v718_v27 = vld [vmem:[%s928_s1 + $0xb0] sm:$0xff]   ;;  %v724_v34 = vld [vmem:[%s928_s1 + $0xb8] sm:$0xff]   ;;  %462 = vmatprep.mubr.bf16.mxu0 %v571_v33  ;;  %v572_v37 = vcombine.low %v16_v36, %v16_v36  ;;  %v573_v38 = vcombine.high %v16_v36, %v16_v36  ;;  %v728_v39 = vld [vmem:[%s928_s1 + $0x100] sm:$0xff]  }
   0xd   :  { %652 = vmatpush3.bf16.msra.mxu1 %v702_v11  ;;  %v729_v40 = vld [vmem:[%s928_s1 + $0x148] sm:$0xff]   ;;  %v731_v42 = vld [vmem:[%s928_s1 + $0x150] sm:$0xff]   ;;  %v733_v44 = vld [vmem:[%s928_s1 + $0x158] sm:$0xff]  }
   0xe   :  { %653 = vmatprep.subr.bf16.mxu1 %v705_v14  ;;  %502 = vmatprep.mubr.bf16.mxu1 %v573_v38  ;;  %v730_v41 = vld [vmem:[%s928_s1 + $0x108] sm:$0xff]   ;;  %v732_v43 = vld [vmem:[%s928_s1 + $0x110] sm:$0xff]   ;;  %v734_v45 = vld [vmem:[%s928_s1 + $0x118] sm:$0xff]  }
   0xf   :  { %632 = vmatpush3.bf16.msra.mxu0 %v704_v13  ;;  %v735_v46 = vld [vmem:[%s928_s1 + $0x160] sm:$0xff]   ;;  %v17_v48 = vld [vmem:[%s929_s0 + $0x10] sm:$0xff]  ;;  %v737_v49 = vld [vmem:[%s928_s1 + $0x168] sm:$0xff]   ;;  %v550_v13 = vlaneseq }
  0x10   :  { %633 = vmatprep.subr.bf16.mxu0 %v707_v16  ;;  %v736_v47 = vld [vmem:[%s928_s1 + $0x120] sm:$0xff]   ;;  %v575_v50 = vcombine.high %v17_v48, %v17_v48  ;;  %v738_v51 = vld [vmem:[%s928_s1 + $0x128] sm:$0xff]   ;;  %v739_v52 = vld [vmem:[%s928_s1 + $0x170] sm:$0xff]   ;;  %v574_v56 = vcombine.low %v17_v48, %v17_v48 }
  0x11   :  { %654 = vmatpush3.bf16.msra.mxu1 %v706_v15  ;;  %v740_v53 = vld [vmem:[%s928_s1 + $0x130] sm:$0xff]   ;;  %v741_v54 = vld [vmem:[%s928_s1 + $0x178] sm:$0xff]   ;;  %v569_v58 = vld [vmem:[%s930_s2] ss:$0 sm:$0xff]  ;;  %v551_v15 = vand.u32 127, %v550_v13 }
  0x12   :  { %655 = vmatprep.subr.bf16.mxu1 %v709_v18  ;;  %v742_v55 = vld [vmem:[%s928_s1 + $0x138] sm:$0xff]  }
  0x13   :  { %634 = vmatpush3.bf16.msra.mxu0 %v708_v17  ;;  %vm553_vm0 = vcmp.ge.s32.totalorder %v551_v15, 11  ;;  %vm554_vm1 = vcmp.le.s32.totalorder %v551_v15, 20  ;;  %vm552_vm2 = vcmp.eq.s32.totalorder %v551_v15, 0 }
  0x14   :  { %635 = vmatprep.subr.bf16.mxu0 %v711_v20  ;;  %vm555_vm3 = vmand %vm553_vm0, %vm554_vm1 }
  0x15   :  { %656 = vmatpush3.bf16.msra.mxu1 %v710_v19  ;;  %vm556_vm4 = vmor %vm552_vm2, %vm555_vm3 }
  0x16   :  { %657 = vmatprep.subr.bf16.mxu1 %v713_v22 }
  0x17   :  { %636 = vmatpush3.bf16.msra.mxu0 %v712_v21 }
  0x18   :  { %637 = vmatprep.subr.bf16.mxu0 %v715_v24 }
  0x19   :  { %658 = vmatpush3.bf16.msra.mxu1 %v714_v23 }
  0x1a   :  { %659 = vmatprep.subr.bf16.mxu1 %v717_v26 }
  0x1b   :  { %638 = vmatpush3.bf16.msra.mxu0 %v716_v25 }
  0x1c   :  { %639 = vmatprep.subr.bf16.mxu0 %v719_v28 }
  0x1d   :  { %660 = vmatpush3.bf16.msra.mxu1 %v718_v27 }
  0x1e   :  { %661 = vmatprep.subr.bf16.mxu1 %v721_v30 }
  0x1f   :  { %640 = vmatpush3.bf16.msra.mxu0 %v720_v29 }
  0x20   :  { %669 = vmatprep.subr.bf16.mxu0 %v725_v35 }
  0x21   :  { %662 = vmatpush3.bf16.msra.mxu1 %v724_v34 }
  0x22   :  { %463 = vmatmul.mubr.bf16.vlgmr.msra.gmra.mrb[0].mxu0 %v570_v32 }
  0x23   :  { %670 = vmatpush3.bf16.msra.mxu0 %v728_v39  ;;  %542 = vmatprep.mubr.bf16.mxu0 %v575_v50 }
  0x24   :  { %503 = vmatmul.mubr.bf16.vlgmr.msra.gmra.mrb[0].mxu1 %v572_v37  ;;  %671 = vmatprep.subr.bf16.mxu0 %v729_v40 }
  0x27   :  { %672 = vmatpush3.bf16.msra.mxu0 %v730_v41 }
  0x28   :  { %673 = vmatprep.subr.bf16.mxu0 %v731_v42 }
  0x2b   :  { %674 = vmatpush3.bf16.msra.mxu0 %v732_v43 }
  0x2c   :  { %675 = vmatprep.subr.bf16.mxu0 %v733_v44 }
  0x2f   :  { %676 = vmatpush3.bf16.msra.mxu0 %v734_v45 }
  0x30   :  { %677 = vmatprep.subr.bf16.mxu0 %v735_v46 }
  0x33   :  { %678 = vmatpush3.bf16.msra.mxu0 %v736_v47 }
  0x34   :  { %679 = vmatprep.subr.bf16.mxu0 %v737_v49 }
  0x37   :  { %680 = vmatpush3.bf16.msra.mxu0 %v738_v51 }
  0x38   :  { %681 = vmatprep.subr.bf16.mxu0 %v739_v52 }
  0x3b   :  { %682 = vmatpush3.bf16.msra.mxu0 %v740_v53 }
  0x3c   :  { %683 = vmatprep.subr.bf16.mxu0 %v741_v54 }
  0x3f   :  { %684 = vmatpush3.bf16.msra.mxu0 %v742_v55 }
  0x42   :  { %543 = vmatmul.mubr.bf16.vlgmr.msra.gmra.mrb[4].mxu0 %v574_v56 }
  0xf5   :  { %v641_v57 = vpop.f32.mrb[0].mxu0 }
  0xf6   :  { %v642_v59 = vpop.f32.mrb[1].mxu0 }
  0xf7   :  { %v643_v60 = vadd.f32 %v642_v59, %v641_v57  ;;  %v644_v61 = vpop.f32.mrb[2].mxu0  ;;  %v663_v62 = vpop.f32.mrb[0].mxu1 }
  0xf8   :  { %v645_v63 = vpop.f32.mrb[3].mxu0  ;;  %v664_v0 = vpop.f32.mrb[1].mxu1 }
  0xf9   :  { %v465_v1 = vadd.f32 %v643_v60, %v569_v58  ;;  %v665_v2 = vadd.f32 %v664_v0, %v663_v62  ;;  %v666_v3 = vpop.f32.mrb[2].mxu1 }
  0xfa   :  { %v667_v4 = vpop.f32.mrb[3].mxu1 }
  0xfb   :  { %v505_v5 = vadd.f32 %v665_v2, %v465_v1 }
 0x115   :  { %v685_v6 = vpop.f32.mrb[4].mxu0 }
 0x116   :  { %v686_v7 = vpop.f32.mrb[5].mxu0 }
 0x117   :  { %v687_v8 = vadd.f32 %v686_v7, %v685_v6  ;;  %v688_v9 = vpop.f32.mrb[6].mxu0 }
 0x118   :  { %v689_v10 = vpop.f32.mrb[7].mxu0 }
 0x119   :  { %v545_v11 = vadd.f32 %v687_v8, %v505_v5 }
 0x11b   :  { %v624_v12 = vmul.f32 -1.442695, %v545_v11 }
 0x11d   :  { %745 = vpow2.f32 %v624_v12 }
 0x127   :  { %v746_v14 = vpop.eup %745 }
 0x128   :  { %v560_v16 = vadd.f32 1.0, %v746_v14 }
 0x12a   :  { %747 = vrcp.f32 %v560_v16 }
 0x134   :  { %v748_v17 = vpop.eup %747 }
 0x135   :  { %v563_v18 = vsel %vm556_vm4, %v748_v17, %v545_v11 }
 0x136   :  { %564 = vst [vmem:[%s931_s3] sm:$0xff] %v563_v18 }

// kernel: model_forward.2
= control target key start
LH: loop header
LB: loop body
LE: loop exit
PB: predicated region body
PF: predicated region fallthrough
CT: control target
= control target key end

     0   :  { %vm23_vm0 = vcmask 7168   ;;  %s2979_s1 = inlined_call_operand.vmem [shape: bf16[768,512], index: 1, kind: input, shape index: {}]   ;;  %s2980_s0 = inlined_call_operand.vmem [shape: bf16[16,768], index: 0, kind: input, shape index: {}]   ;;  %s2981_s2 = inlined_call_operand.vmem [shape: f32[1,512], index: 2, kind: input, shape index: {}]   ;;  %s2982_s3 = inlined_call_operand.vmem [shape: s32[16,1], index: 3, kind: input, shape index: {}]   ;;  %s2983_s4 = inlined_call_operand.vmem [shape: f32[1,8,128], index: 4, kind: output, shape index: {}]  }
   0x1   :  { %v1926_v0 = vld [vmem:[%s2979_s1 + $0x4] ss:$16 sps:$4 sm:$0xff]   ;;  %v1928_v1 = vld [vmem:[%s2979_s1 + $0xc] ss:$16 sps:$4 sm:$0xff]   ;;  %v1930_v2 = vld [vmem:[%s2979_s1] ss:$16 sps:$4 sm:$0xff]  }
   0x2   :  { %1242 = vmatprep.subr.bf16.mxu0 %v1926_v0  ;;  %v1931_v3 = vld [vmem:[%s2979_s1 + $0x8] ss:$16 sps:$4 sm:$0xff]   ;;  %1371 = vmatprep.subr.bf16.mxu1 %v1928_v1  ;;  %v1932_v4 = vld [vmem:[%s2979_s1 + $0x24] ss:$16 sps:$4 sm:$0xff]   ;;  %v1934_v5 = vld [vmem:[%s2979_s1 + $0x2c] ss:$16 sps:$4 sm:$0xff]  }
   0x3   :  { %1243 = vmatpush1.bf16.msra.mxu0 %v1930_v2  ;;  %1372 = vmatpush1.bf16.msra.mxu1 %v1931_v3  ;;  %v1936_v6 = vld [vmem:[%s2979_s1 + $0x20] ss:$16 sps:$4 sm:$0xff]   ;;  %v1937_v7 = vld [vmem:[%s2979_s1 + $0x28] ss:$16 sps:$4 sm:$0xff]   ;;  %v1938_v8 = vld [vmem:[%s2979_s1 + $0x44] ss:$16 sps:$4 sm:$0xff]  }
   0x4   :  { %1244 = vmatprep.subr.bf16.mxu0 %v1932_v4  ;;  %1373 = vmatprep.subr.bf16.mxu1 %v1934_v5  ;;  %v1940_v9 = vld [vmem:[%s2979_s1 + $0x4c] ss:$16 sps:$4 sm:$0xff]   ;;  %v1942_v10 = vld [vmem:[%s2979_s1 + $0x40] ss:$16 sps:$4 sm:$0xff]   ;;  %v1943_v11 = vld [vmem:[%s2979_s1 + $0x48] ss:$16 sps:$4 sm:$0xff]  }
   0x5   :  { %v1944_v12 = vld [vmem:[%s2979_s1 + $0x64] ss:$16 sps:$4 sm:$0xff]   ;;  %v1946_v13 = vld [vmem:[%s2979_s1 + $0x6c] ss:$16 sps:$4 sm:$0xff]   ;;  %v1948_v14 = vld [vmem:[%s2979_s1 + $0x60] ss:$16 sps:$4 sm:$0xff]  }
   0x6   :  { %v1949_v15 = vld [vmem:[%s2979_s1 + $0x68] ss:$16 sps:$4 sm:$0xff]   ;;  %v1950_v16 = vld [vmem:[%s2979_s1 + $0x84] ss:$16 sps:$4 sm:$0xff]   ;;  %v1952_v17 = vld [vmem:[%s2979_s1 + $0x8c] ss:$16 sps:$4 sm:$0xff]  }
   0x7   :  { %1245 = vmatpush1.bf16.msra.mxu0 %v1936_v6  ;;  %1374 = vmatpush1.bf16.msra.mxu1 %v1937_v7  ;;  %v1954_v18 = vld [vmem:[%s2979_s1 + $0x80] ss:$16 sps:$4 sm:$0xff]   ;;  %v1955_v19 = vld [vmem:[%s2979_s1 + $0x88] ss:$16 sps:$4 sm:$0xff]   ;;  %v1956_v20 = vld [vmem:[%s2979_s1 + $0xa4] ss:$16 sps:$4 sm:$0xff]  }
   0x8   :  { %1246 = vmatprep.subr.bf16.mxu0 %v1938_v8  ;;  %1375 = vmatprep.subr.bf16.mxu1 %v1940_v9  ;;  %v1958_v21 = vld [vmem:[%s2979_s1 + $0xac] ss:$16 sps:$4 sm:$0xff]   ;;  %v1960_v22 = vld [vmem:[%s2979_s1 + $0xa0] ss:$16 sps:$4 sm:$0xff]   ;;  %v1961_v23 = vld [vmem:[%s2979_s1 + $0xa8] ss:$16 sps:$4 sm:$0xff]  }
   0x9   :  { %v1962_v24 = vld [vmem:[%s2979_s1 + $0xc4] ss:$16 sps:$4 sm:$0xff]   ;;  %v1964_v25 = vld [vmem:[%s2979_s1 + $0xcc] ss:$16 sps:$4 sm:$0xff]   ;;  %v1966_v26 = vld [vmem:[%s2979_s1 + $0xc0] ss:$16 sps:$4 sm:$0xff]  }
   0xa   :  { %v1967_v27 = vld [vmem:[%s2979_s1 + $0xc8] ss:$16 sps:$4 sm:$0xff]   ;;  %v1968_v28 = vld [vmem:[%s2979_s1 + $0xe4] ss:$16 sps:$4 sm:$0xff]   ;;  %v1970_v29 = vld [vmem:[%s2979_s1 + $0xec] ss:$16 sps:$4 sm:$0xff]  }
   0xb   :  { %1247 = vmatpush1.bf16.msra.mxu0 %v1942_v10  ;;  %1376 = vmatpush1.bf16.msra.mxu1 %v1943_v11  ;;  %v1972_v30 = vld [vmem:[%s2979_s1 + $0xe0] ss:$16 sps:$4 sm:$0xff]   ;;  %v1973_v31 = vld [vmem:[%s2979_s1 + $0xe8] ss:$16 sps:$4 sm:$0xff]   ;;  %v1974_v32 = vld [vmem:[%s2979_s1 + $0x104] ss:$16 sps:$4 sm:$0xff]  }
   0xc   :  { %1248 = vmatprep.subr.bf16.mxu0 %v1944_v12  ;;  %1377 = vmatprep.subr.bf16.mxu1 %v1946_v13  ;;  %v1976_v33 = vld [vmem:[%s2979_s1 + $0x10c] ss:$16 sps:$4 sm:$0xff]   ;;  %v1978_v34 = vld [vmem:[%s2979_s1 + $0x100] ss:$16 sps:$4 sm:$0xff]   ;;  %v1979_v35 = vld [vmem:[%s2979_s1 + $0x108] ss:$16 sps:$4 sm:$0xff]  }
   0xd   :  { %v1980_v36 = vld [vmem:[%s2979_s1 + $0x124] ss:$16 sps:$4 sm:$0xff]   ;;  %v1982_v37 = vld [vmem:[%s2979_s1 + $0x12c] ss:$16 sps:$4 sm:$0xff]   ;;  %v1984_v38 = vld [vmem:[%s2979_s1 + $0x120] ss:$16 sps:$4 sm:$0xff]  }
   0xe   :  { %v1985_v39 = vld [vmem:[%s2979_s1 + $0x128] ss:$16 sps:$4 sm:$0xff]   ;;  %v1986_v40 = vld [vmem:[%s2979_s1 + $0x144] ss:$16 sps:$4 sm:$0xff]   ;;  %v1988_v41 = vld [vmem:[%s2979_s1 + $0x14c] ss:$16 sps:$4 sm:$0xff]  }
   0xf   :  { %1249 = vmatpush1.bf16.msra.mxu0 %v1948_v14  ;;  %1378 = vmatpush1.bf16.msra.mxu1 %v1949_v15  ;;  %v1990_v42 = vld [vmem:[%s2979_s1 + $0x140] ss:$16 sps:$4 sm:$0xff]   ;;  %v1991_v43 = vld [vmem:[%s2979_s1 + $0x148] ss:$16 sps:$4 sm:$0xff]   ;;  %v1992_v44 = vld [vmem:[%s2979_s1 + $0x164] ss:$16 sps:$4 sm:$0xff]  }
  0x10   :  { %1250 = vmatprep.subr.bf16.mxu0 %v1950_v16  ;;  %1379 = vmatprep.subr.bf16.mxu1 %v1952_v17  ;;  %v1994_v45 = vld [vmem:[%s2979_s1 + $0x16c] ss:$16 sps:$4 sm:$0xff]   ;;  %v1996_v46 = vld [vmem:[%s2979_s1 + $0x160] ss:$16 sps:$4 sm:$0xff]   ;;  %v1997_v47 = vld [vmem:[%s2979_s1 + $0x168] ss:$16 sps:$4 sm:$0xff]  }
  0x11   :  { %v2024_v48 = vld [vmem:[%s2980_s0 + $0x4] ss:$24 sps:$4 sm:$0xff]   ;;  %v2002_v51 = vld [vmem:[%s2979_s1 + $0x180] ss:$16 sps:$4 sm:$0xff]   ;;  %v2003_v52 = vld [vmem:[%s2979_s1 + $0x188] ss:$16 sps:$4 sm:$0xff]  }
  0x12   :  { %v1998_v49 = vld [vmem:[%s2979_s1 + $0x184] ss:$16 sps:$4 sm:$0xff]   ;;  %v2000_v50 = vld [vmem:[%s2979_s1 + $0x18c] ss:$16 sps:$4 sm:$0xff]   ;;  %1274 = vmatprep.mubr.bf16.mxu0 %v2024_v48  ;;  %1403 = vmatprep.mubr.bf16.mxu1 %v2024_v48  ;;  %v2008_v55 = vld [vmem:[%s2979_s1 + $0x1a0] ss:$16 sps:$4 sm:$0xff]  }
  0x13   :  { %1251 = vmatpush1.bf16.msra.mxu0 %v1954_v18  ;;  %1380 = vmatpush1.bf16.msra.mxu1 %v1955_v19  ;;  %v2004_v53 = vld [vmem:[%s2979_s1 + $0x1a4] ss:$16 sps:$4 sm:$0xff]   ;;  %v2006_v54 = vld [vmem:[%s2979_s1 + $0x1ac] ss:$16 sps:$4 sm:$0xff]   ;;  %v2009_v56 = vld [vmem:[%s2979_s1 + $0x1a8] ss:$16 sps:$4 sm:$0xff]  }
  0x14   :  { %1252 = vmatprep.subr.bf16.mxu0 %v1956_v20  ;;  %1381 = vmatprep.subr.bf16.mxu1 %v1958_v21  ;;  %v2010_v57 = vld [vmem:[%s2979_s1 + $0x1c4] ss:$16 sps:$4 sm:$0xff]   ;;  %v2012_v58 = vld [vmem:[%s2979_s1 + $0x1cc] ss:$16 sps:$4 sm:$0xff]   ;;  %v2014_v59 = vld [vmem:[%s2979_s1 + $0x1c0] ss:$16 sps:$4 sm:$0xff]  }
  0x15   :  { %v2015_v60 = vld [vmem:[%s2979_s1 + $0x1c8] ss:$16 sps:$4 sm:$0xff]   ;;  %v2016_v61 = vld [vmem:[%s2979_s1 + $0x1e4] ss:$16 sps:$4 sm:$0xff]   ;;  %v2018_v62 = vld [vmem:[%s2979_s1 + $0x1ec] ss:$16 sps:$4 sm:$0xff]  }
  0x16   :  { %v2020_v63 = vld [vmem:[%s2979_s1 + $0x1e0] ss:$16 sps:$4 sm:$0xff]   ;;  %v2021_v0 = vld [vmem:[%s2979_s1 + $0x1e8] ss:$16 sps:$4 sm:$0xff]   ;;  %v2027_v1 = vld [vmem:[%s2979_s1 + $0x204] ss:$16 sps:$4 sm:$0xff]  }
  0x17   :  { %1253 = vmatpush1.bf16.msra.mxu0 %v1960_v22  ;;  %1382 = vmatpush1.bf16.msra.mxu1 %v1961_v23  ;;  %v2030_v2 = vld [vmem:[%s2979_s1 + $0x20c] ss:$16 sps:$4 sm:$0xff]   ;;  %v2022_v3 = vld [vmem:[%s2980_s0] ss:$24 sps:$4 sm:$0xff]   ;;  %v2033_v6 = vld [vmem:[%s2979_s1 + $0x224] ss:$16 sps:$4 sm:$0xff]  }
  0x18   :  { %1254 = vmatprep.subr.bf16.mxu0 %v1962_v24  ;;  %1383 = vmatprep.subr.bf16.mxu1 %v1964_v25  ;;  %v2025_v4 = vld [vmem:[%s2979_s1 + $0x200] ss:$16 sps:$4 sm:$0xff]   ;;  %v2028_v5 = vld [vmem:[%s2979_s1 + $0x208] ss:$16 sps:$4 sm:$0xff]   ;;  %v2036_v7 = vld [vmem:[%s2979_s1 + $0x22c] ss:$16 sps:$4 sm:$0xff]  }
  0x19   :  { %v2031_v8 = vld [vmem:[%s2979_s1 + $0x220] ss:$16 sps:$4 sm:$0xff]   ;;  %v2034_v9 = vld [vmem:[%s2979_s1 + $0x228] ss:$16 sps:$4 sm:$0xff]   ;;  %v2039_v10 = vld [vmem:[%s2979_s1 + $0x244] ss:$16 sps:$4 sm:$0xff]  }
  0x1a   :  { %v2042_v11 = vld [vmem:[%s2979_s1 + $0x24c] ss:$16 sps:$4 sm:$0xff]   ;;  %v2037_v12 = vld [vmem:[%s2979_s1 + $0x240] ss:$16 sps:$4 sm:$0xff]   ;;  %v2040_v13 = vld [vmem:[%s2979_s1 + $0x248] ss:$16 sps:$4 sm:$0xff]  }
  0x1b   :  { %1255 = vmatpush1.bf16.msra.mxu0 %v1966_v26  ;;  %1384 = vmatpush1.bf16.msra.mxu1 %v1967_v27  ;;  %v2045_v14 = vld [vmem:[%s2979_s1 + $0x264] ss:$16 sps:$4 sm:$0xff]   ;;  %v2048_v15 = vld [vmem:[%s2979_s1 + $0x26c] ss:$16 sps:$4 sm:$0xff]   ;;  %v2043_v16 = vld [vmem:[%s2979_s1 + $0x260] ss:$16 sps:$4 sm:$0xff]  }
  0x1c   :  { %1256 = vmatprep.subr.bf16.mxu0 %v1968_v28  ;;  %1385 = vmatprep.subr.bf16.mxu1 %v1970_v29  ;;  %v2046_v17 = vld [vmem:[%s2979_s1 + $0x268] ss:$16 sps:$4 sm:$0xff]   ;;  %v2051_v18 = vld [vmem:[%s2979_s1 + $0x284] ss:$16 sps:$4 sm:$0xff]   ;;  %v2054_v19 = vld [vmem:[%s2979_s1 + $0x28c] ss:$16 sps:$4 sm:$0xff]  }
  0x1d   :  { %v2049_v20 = vld [vmem:[%s2979_s1 + $0x280] ss:$16 sps:$4 sm:$0xff]   ;;  %v2052_v21 = vld [vmem:[%s2979_s1 + $0x288] ss:$16 sps:$4 sm:$0xff]   ;;  %v2057_v22 = vld [vmem:[%s2979_s1 + $0x2a4] ss:$16 sps:$4 sm:$0xff]  }
  0x1e   :  { %v2060_v23 = vld [vmem:[%s2979_s1 + $0x2ac] ss:$16 sps:$4 sm:$0xff]   ;;  %v2055_v24 = vld [vmem:[%s2979_s1 + $0x2a0] ss:$16 sps:$4 sm:$0xff]   ;;  %v2058_v25 = vld [vmem:[%s2979_s1 + $0x2a8] ss:$16 sps:$4 sm:$0xff]  }
  0x1f   :  { %1257 = vmatpush1.bf16.msra.mxu0 %v1972_v30  ;;  %1386 = vmatpush1.bf16.msra.mxu1 %v1973_v31  ;;  %v2063_v26 = vld [vmem:[%s2979_s1 + $0x2c4] ss:$16 sps:$4 sm:$0xff]   ;;  %v2066_v27 = vld [vmem:[%s2979_s1 + $0x2cc] ss:$16 sps:$4 sm:$0xff]   ;;  %v2061_v28 = vld [vmem:[%s2979_s1 + $0x2c0] ss:$16 sps:$4 sm:$0xff]  }
  0x20   :  { %1258 = vmatprep.subr.bf16.mxu0 %v1974_v32  ;;  %1387 = vmatprep.subr.bf16.mxu1 %v1976_v33  ;;  %v2064_v29 = vld [vmem:[%s2979_s1 + $0x2c8] ss:$16 sps:$4 sm:$0xff]   ;;  %v2123_v30 = vld [vmem:[%s2980_s0 + $0xc] ss:$24 sps:$4 sm:$0xff]   ;;  %v2067_v33 = vld [vmem:[%s2979_s1 + $0x2e0] ss:$16 sps:$4 sm:$0xff]  }
  0x21   :  { %v2069_v31 = vld [vmem:[%s2979_s1 + $0x2e4] ss:$16 sps:$4 sm:$0xff]   ;;  %v2072_v32 = vld [vmem:[%s2979_s1 + $0x2ec] ss:$16 sps:$4 sm:$0xff]  }
  0x22   :  { %v2096_v48 = vld [vmem:[%s2979_s1 + $0x36c] ss:$16 sps:$4 sm:$0xff]  }
  0x23   :  { %1259 = vmatpush1.bf16.msra.mxu0 %v1978_v34  ;;  %1388 = vmatpush1.bf16.msra.mxu1 %v1979_v35  ;;  %v2070_v34 = vld [vmem:[%s2979_s1 + $0x2e8] ss:$16 sps:$4 sm:$0xff]   ;;  %v2075_v35 = vld [vmem:[%s2979_s1 + $0x304] ss:$16 sps:$4 sm:$0xff]  }
  0x24   :  { %1260 = vmatprep.subr.bf16.mxu0 %v1980_v36  ;;  %1389 = vmatprep.subr.bf16.mxu1 %v1982_v37  ;;  %v2078_v36 = vld [vmem:[%s2979_s1 + $0x30c] ss:$16 sps:$4 sm:$0xff]   ;;  %v2073_v37 = vld [vmem:[%s2979_s1 + $0x300] ss:$16 sps:$4 sm:$0xff]  }
  0x27   :  { %1261 = vmatpush1.bf16.msra.mxu0 %v1984_v38  ;;  %1390 = vmatpush1.bf16.msra.mxu1 %v1985_v39  ;;  %v2076_v38 = vld [vmem:[%s2979_s1 + $0x308] ss:$16 sps:$4 sm:$0xff]   ;;  %v2081_v39 = vld [vmem:[%s2979_s1 + $0x324] ss:$16 sps:$4 sm:$0xff]  }
  0x28   :  { %1262 = vmatprep.subr.bf16.mxu0 %v1986_v40  ;;  %1391 = vmatprep.subr.bf16.mxu1 %v1988_v41  ;;  %v2084_v40 = vld [vmem:[%s2979_s1 + $0x32c] ss:$16 sps:$4 sm:$0xff]   ;;  %v2079_v41 = vld [vmem:[%s2979_s1 + $0x320] ss:$16 sps:$4 sm:$0xff]  }
  0x2b   :  { %1263 = vmatpush1.bf16.msra.mxu0 %v1990_v42  ;;  %1392 = vmatpush1.bf16.msra.mxu1 %v1991_v43  ;;  %v2082_v42 = vld [vmem:[%s2979_s1 + $0x328] ss:$16 sps:$4 sm:$0xff]   ;;  %v2087_v43 = vld [vmem:[%s2979_s1 + $0x344] ss:$16 sps:$4 sm:$0xff]  }
  0x2c   :  { %1264 = vmatprep.subr.bf16.mxu0 %v1992_v44  ;;  %1393 = vmatprep.subr.bf16.mxu1 %v1994_v45  ;;  %v2090_v44 = vld [vmem:[%s2979_s1 + $0x34c] ss:$16 sps:$4 sm:$0xff]   ;;  %v2085_v45 = vld [vmem:[%s2979_s1 + $0x340] ss:$16 sps:$4 sm:$0xff]  }
  0x2f   :  { %1265 = vmatpush1.bf16.msra.mxu0 %v1996_v46  ;;  %1394 = vmatpush1.bf16.msra.mxu1 %v1997_v47  ;;  %v2088_v46 = vld [vmem:[%s2979_s1 + $0x348] ss:$16 sps:$4 sm:$0xff]   ;;  %v2093_v47 = vld [vmem:[%s2979_s1 + $0x364] ss:$16 sps:$4 sm:$0xff]  }
  0x30   :  { %1266 = vmatprep.subr.bf16.mxu0 %v1998_v49  ;;  %1395 = vmatprep.subr.bf16.mxu1 %v2000_v50  ;;  %v2091_v49 = vld [vmem:[%s2979_s1 + $0x360] ss:$16 sps:$4 sm:$0xff]   ;;  %v2094_v50 = vld [vmem:[%s2979_s1 + $0x368] ss:$16 sps:$4 sm:$0xff]  }
  0x33   :  { %1267 = vmatpush1.bf16.msra.mxu0 %v2002_v51  ;;  %1396 = vmatpush1.bf16.msra.mxu1 %v2003_v52  ;;  %v2099_v51 = vld [vmem:[%s2979_s1 + $0x384] ss:$16 sps:$4 sm:$0xff]   ;;  %v2102_v52 = vld [vmem:[%s2979_s1 + $0x38c] ss:$16 sps:$4 sm:$0xff]  }
  0x34   :  { %1268 = vmatprep.subr.bf16.mxu0 %v2004_v53  ;;  %1397 = vmatprep.subr.bf16.mxu1 %v2006_v54  ;;  %v2097_v53 = vld [vmem:[%s2979_s1 + $0x380] ss:$16 sps:$4 sm:$0xff]   ;;  %v2100_v54 = vld [vmem:[%s2979_s1 + $0x388] ss:$16 sps:$4 sm:$0xff]  }
  0x37   :  { %1269 = vmatpush1.bf16.msra.mxu0 %v2008_v55  ;;  %1398 = vmatpush1.bf16.msra.mxu1 %v2009_v56  ;;  %v2105_v55 = vld [vmem:[%s2979_s1 + $0x3a4] ss:$16 sps:$4 sm:$0xff]   ;;  %v2108_v56 = vld [vmem:[%s2979_s1 + $0x3ac] ss:$16 sps:$4 sm:$0xff]  }
  0x38   :  { %1270 = vmatprep.subr.bf16.mxu0 %v2010_v57  ;;  %1399 = vmatprep.subr.bf16.mxu1 %v2012_v58  ;;  %v2103_v57 = vld [vmem:[%s2979_s1 + $0x3a0] ss:$16 sps:$4 sm:$0xff]   ;;  %v2106_v58 = vld [vmem:[%s2979_s1 + $0x3a8] ss:$16 sps:$4 sm:$0xff]  }
  0x3b   :  { %1271 = vmatpush1.bf16.msra.mxu0 %v2014_v59  ;;  %1400 = vmatpush1.bf16.msra.mxu1 %v2015_v60  ;;  %v2111_v59 = vld [vmem:[%s2979_s1 + $0x3c4] ss:$16 sps:$4 sm:$0xff]   ;;  %v2114_v60 = vld [vmem:[%s2979_s1 + $0x3cc] ss:$16 sps:$4 sm:$0xff]  }
  0x3c   :  { %1272 = vmatprep.subr.bf16.mxu0 %v2016_v61  ;;  %1401 = vmatprep.subr.bf16.mxu1 %v2018_v62  ;;  %v2109_v61 = vld [vmem:[%s2979_s1 + $0x3c0] ss:$16 sps:$4 sm:$0xff]   ;;  %v2112_v62 = vld [vmem:[%s2979_s1 + $0x3c8] ss:$16 sps:$4 sm:$0xff]  }
  0x3f   :  { %1273 = vmatpush1.bf16.msra.mxu0 %v2020_v63  ;;  %1402 = vmatpush1.bf16.msra.mxu1 %v2021_v0  ;;  %v2117_v63 = vld [vmem:[%s2979_s1 + $0x3e4] ss:$16 sps:$4 sm:$0xff]   ;;  %v2120_v0 = vld [vmem:[%s2979_s1 + $0x3ec] ss:$16 sps:$4 sm:$0xff]  }
  0x40   :  { %1285 = vmatprep.subr.bf16.mxu0 %v2027_v1  ;;  %1414 = vmatprep.subr.bf16.mxu1 %v2030_v2  ;;  %v2115_v1 = vld [vmem:[%s2979_s1 + $0x3e0] ss:$16 sps:$4 sm:$0xff]   ;;  %v2118_v2 = vld [vmem:[%s2979_s1 + $0x3e8] ss:$16 sps:$4 sm:$0xff]  }
  0x42   :  { %1275 = vmatmul.mubr.bf16.vlgmr.msra.gmra.mrb[0].mxu0 %v2022_v3  ;;  %1404 = vmatmul.mubr.bf16.vlgmr.msra.gmra.mrb[0].mxu1 %v2022_v3  ;;  %v2126_v3 = vld [vmem:[%s2979_s1 + $0x404] ss:$16 sps:$4 sm:$0xff]  }
  0x43   :  { %1286 = vmatpush1.bf16.msra.mxu0 %v2025_v4  ;;  %1415 = vmatpush1.bf16.msra.mxu1 %v2028_v5  ;;  %v2129_v4 = vld [vmem:[%s2979_s1 + $0x40c] ss:$16 sps:$4 sm:$0xff]   ;;  %v2121_v5 = vld [vmem:[%s2980_s0 + $0x8] ss:$24 sps:$4 sm:$0xff]  }
  0x44   :  { %1287 = vmatprep.subr.bf16.mxu0 %v2033_v6  ;;  %1416 = vmatprep.subr.bf16.mxu1 %v2036_v7  ;;  %v2124_v6 = vld [vmem:[%s2979_s1 + $0x400] ss:$16 sps:$4 sm:$0xff]   ;;  %v2127_v7 = vld [vmem:[%s2979_s1 + $0x408] ss:$16 sps:$4 sm:$0xff]  }
  0x45   :  { %1317 = vmatprep.mubr.bf16.mxu0 %v2123_v30  ;;  %1446 = vmatprep.mubr.bf16.mxu1 %v2123_v30  ;;  %v2165_v30 = vld [vmem:[%s2979_s1 + $0x4cc] ss:$16 sps:$4 sm:$0xff]  }
  0x47   :  { %1288 = vmatpush1.bf16.msra.mxu0 %v2031_v8  ;;  %1417 = vmatpush1.bf16.msra.mxu1 %v2034_v9  ;;  %v2132_v8 = vld [vmem:[%s2979_s1 + $0x424] ss:$16 sps:$4 sm:$0xff]   ;;  %v2135_v9 = vld [vmem:[%s2979_s1 + $0x42c] ss:$16 sps:$4 sm:$0xff]  }
  0x48   :  { %1289 = vmatprep.subr.bf16.mxu0 %v2039_v10  ;;  %1418 = vmatprep.subr.bf16.mxu1 %v2042_v11  ;;  %v2222_v10 = vld [vmem:[%s2980_s0 + $0x14] ss:$24 sps:$4 sm:$0xff]   ;;  %v2130_v11 = vld [vmem:[%s2979_s1 + $0x420] ss:$16 sps:$4 sm:$0xff]  }
  0x4b   :  { %1290 = vmatpush1.bf16.msra.mxu0 %v2037_v12  ;;  %1419 = vmatpush1.bf16.msra.mxu1 %v2040_v13  ;;  %v2133_v12 = vld [vmem:[%s2979_s1 + $0x428] ss:$16 sps:$4 sm:$0xff]   ;;  %v2138_v13 = vld [vmem:[%s2979_s1 + $0x444] ss:$16 sps:$4 sm:$0xff]  }
  0x4c   :  { %1291 = vmatprep.subr.bf16.mxu0 %v2045_v14  ;;  %1420 = vmatprep.subr.bf16.mxu1 %v2048_v15  ;;  %v2141_v14 = vld [vmem:[%s2979_s1 + $0x44c] ss:$16 sps:$4 sm:$0xff]   ;;  %v2136_v15 = vld [vmem:[%s2979_s1 + $0x440] ss:$16 sps:$4 sm:$0xff]  }
  0x4f   :  { %1292 = vmatpush1.bf16.msra.mxu0 %v2043_v16  ;;  %1421 = vmatpush1.bf16.msra.mxu1 %v2046_v17  ;;  %v2139_v16 = vld [vmem:[%s2979_s1 + $0x448] ss:$16 sps:$4 sm:$0xff]   ;;  %v2144_v17 = vld [vmem:[%s2979_s1 + $0x464] ss:$16 sps:$4 sm:$0xff]  }
  0x50   :  { %1293 = vmatprep.subr.bf16.mxu0 %v2051_v18  ;;  %1422 = vmatprep.subr.bf16.mxu1 %v2054_v19  ;;  %v2147_v18 = vld [vmem:[%s2979_s1 + $0x46c] ss:$16 sps:$4 sm:$0xff]   ;;  %v2142_v19 = vld [vmem:[%s2979_s1 + $0x460] ss:$16 sps:$4 sm:$0xff]  }
  0x53   :  { %1294 = vmatpush1.bf16.msra.mxu0 %v2049_v20  ;;  %1423 = vmatpush1.bf16.msra.mxu1 %v2052_v21  ;;  %v2145_v20 = vld [vmem:[%s2979_s1 + $0x468] ss:$16 sps:$4 sm:$0xff]   ;;  %v2150_v21 = vld [vmem:[%s2979_s1 + $0x484] ss:$16 sps:$4 sm:$0xff]  }
  0x54   :  { %1295 = vmatprep.subr.bf16.mxu0 %v2057_v22  ;;  %1424 = vmatprep.subr.bf16.mxu1 %v2060_v23  ;;  %v2153_v22 = vld [vmem:[%s2979_s1 + $0x48c] ss:$16 sps:$4 sm:$0xff]   ;;  %v2148_v23 = vld [vmem:[%s2979_s1 + $0x480] ss:$16 sps:$4 sm:$0xff]  }
  0x57   :  { %1296 = vmatpush1.bf16.msra.mxu0 %v2055_v24  ;;  %1425 = vmatpush1.bf16.msra.mxu1 %v2058_v25  ;;  %v2151_v24 = vld [vmem:[%s2979_s1 + $0x488] ss:$16 sps:$4 sm:$0xff]   ;;  %v2156_v25 = vld [vmem:[%s2979_s1 + $0x4a4] ss:$16 sps:$4 sm:$0xff]  }
  0x58   :  { %1297 = vmatprep.subr.bf16.mxu0 %v2063_v26  ;;  %1426 = vmatprep.subr.bf16.mxu1 %v2066_v27  ;;  %v2159_v26 = vld [vmem:[%s2979_s1 + $0x4ac] ss:$16 sps:$4 sm:$0xff]   ;;  %v2154_v27 = vld [vmem:[%s2979_s1 + $0x4a0] ss:$16 sps:$4 sm:$0xff]  }
  0x5b   :  { %1298 = vmatpush1.bf16.msra.mxu0 %v2061_v28  ;;  %1427 = vmatpush1.bf16.msra.mxu1 %v2064_v29  ;;  %v2157_v28 = vld [vmem:[%s2979_s1 + $0x4a8] ss:$16 sps:$4 sm:$0xff]   ;;  %v2162_v29 = vld [vmem:[%s2979_s1 + $0x4c4] ss:$16 sps:$4 sm:$0xff]  }
  0x5c   :  { %1299 = vmatprep.subr.bf16.mxu0 %v2069_v31  ;;  %1428 = vmatprep.subr.bf16.mxu1 %v2072_v32  ;;  %v2160_v31 = vld [vmem:[%s2979_s1 + $0x4c0] ss:$16 sps:$4 sm:$0xff]   ;;  %v2163_v32 = vld [vmem:[%s2979_s1 + $0x4c8] ss:$16 sps:$4 sm:$0xff]  }
  0x5f   :  { %1300 = vmatpush1.bf16.msra.mxu0 %v2067_v33  ;;  %1429 = vmatpush1.bf16.msra.mxu1 %v2070_v34  ;;  %v2168_v33 = vld [vmem:[%s2979_s1 + $0x4e4] ss:$16 sps:$4 sm:$0xff]   ;;  %v2171_v34 = vld [vmem:[%s2979_s1 + $0x4ec] ss:$16 sps:$4 sm:$0xff]  }
  0x60   :  { %1301 = vmatprep.subr.bf16.mxu0 %v2075_v35  ;;  %1430 = vmatprep.subr.bf16.mxu1 %v2078_v36  ;;  %v2166_v35 = vld [vmem:[%s2979_s1 + $0x4e0] ss:$16 sps:$4 sm:$0xff]   ;;  %v2169_v36 = vld [vmem:[%s2979_s1 + $0x4e8] ss:$16 sps:$4 sm:$0xff]  }
  0x63   :  { %1302 = vmatpush1.bf16.msra.mxu0 %v2073_v37  ;;  %1431 = vmatpush1.bf16.msra.mxu1 %v2076_v38  ;;  %v2174_v37 = vld [vmem:[%s2979_s1 + $0x504] ss:$16 sps:$4 sm:$0xff]   ;;  %v2177_v38 = vld [vmem:[%s2979_s1 + $0x50c] ss:$16 sps:$4 sm:$0xff]  }
  0x64   :  { %1303 = vmatprep.subr.bf16.mxu0 %v2081_v39  ;;  %1432 = vmatprep.subr.bf16.mxu1 %v2084_v40  ;;  %v2172_v39 = vld [vmem:[%s2979_s1 + $0x500] ss:$16 sps:$4 sm:$0xff]   ;;  %v2175_v40 = vld [vmem:[%s2979_s1 + $0x508] ss:$16 sps:$4 sm:$0xff]  }
  0x67   :  { %1304 = vmatpush1.bf16.msra.mxu0 %v2079_v41  ;;  %1433 = vmatpush1.bf16.msra.mxu1 %v2082_v42  ;;  %v2180_v41 = vld [vmem:[%s2979_s1 + $0x524] ss:$16 sps:$4 sm:$0xff]   ;;  %v2183_v42 = vld [vmem:[%s2979_s1 + $0x52c] ss:$16 sps:$4 sm:$0xff]  }
  0x68   :  { %1305 = vmatprep.subr.bf16.mxu0 %v2087_v43  ;;  %1434 = vmatprep.subr.bf16.mxu1 %v2090_v44  ;;  %v2178_v43 = vld [vmem:[%s2979_s1 + $0x520] ss:$16 sps:$4 sm:$0xff]   ;;  %v2181_v44 = vld [vmem:[%s2979_s1 + $0x528] ss:$16 sps:$4 sm:$0xff]  }
  0x6b   :  { %1306 = vmatpush1.bf16.msra.mxu0 %v2085_v45  ;;  %1435 = vmatpush1.bf16.msra.mxu1 %v2088_v46  ;;  %v2186_v45 = vld [vmem:[%s2979_s1 + $0x544] ss:$16 sps:$4 sm:$0xff]   ;;  %v2189_v46 = vld [vmem:[%s2979_s1 + $0x54c] ss:$16 sps:$4 sm:$0xff]  }
  0x6c   :  { %1307 = vmatprep.subr.bf16.mxu0 %v2093_v47  ;;  %1436 = vmatprep.subr.bf16.mxu1 %v2096_v48  ;;  %v2184_v47 = vld [vmem:[%s2979_s1 + $0x540] ss:$16 sps:$4 sm:$0xff]   ;;  %v2187_v48 = vld [vmem:[%s2979_s1 + $0x548] ss:$16 sps:$4 sm:$0xff]  }
  0x6f   :  { %1308 = vmatpush1.bf16.msra.mxu0 %v2091_v49  ;;  %1437 = vmatpush1.bf16.msra.mxu1 %v2094_v50  ;;  %v2192_v49 = vld [vmem:[%s2979_s1 + $0x564] ss:$16 sps:$4 sm:$0xff]   ;;  %v2195_v50 = vld [vmem:[%s2979_s1 + $0x56c] ss:$16 sps:$4 sm:$0xff]  }
  0x70   :  { %1309 = vmatprep.subr.bf16.mxu0 %v2099_v51  ;;  %1438 = vmatprep.subr.bf16.mxu1 %v2102_v52  ;;  %v2190_v51 = vld [vmem:[%s2979_s1 + $0x560] ss:$16 sps:$4 sm:$0xff]   ;;  %v2193_v52 = vld [vmem:[%s2979_s1 + $0x568] ss:$16 sps:$4 sm:$0xff]  }
  0x73   :  { %1310 = vmatpush1.bf16.msra.mxu0 %v2097_v53  ;;  %1439 = vmatpush1.bf16.msra.mxu1 %v2100_v54  ;;  %v2198_v53 = vld [vmem:[%s2979_s1 + $0x584] ss:$16 sps:$4 sm:$0xff]   ;;  %v2201_v54 = vld [vmem:[%s2979_s1 + $0x58c] ss:$16 sps:$4 sm:$0xff]  }
  0x74   :  { %1311 = vmatprep.subr.bf16.mxu0 %v2105_v55  ;;  %1440 = vmatprep.subr.bf16.mxu1 %v2108_v56  ;;  %v2196_v55 = vld [vmem:[%s2979_s1 + $0x580] ss:$16 sps:$4 sm:$0xff]   ;;  %v2199_v56 = vld [vmem:[%s2979_s1 + $0x588] ss:$16 sps:$4 sm:$0xff]  }
  0x77   :  { %1312 = vmatpush1.bf16.msra.mxu0 %v2103_v57  ;;  %1441 = vmatpush1.bf16.msra.mxu1 %v2106_v58  ;;  %v2204_v57 = vld [vmem:[%s2979_s1 + $0x5a4] ss:$16 sps:$4 sm:$0xff]   ;;  %v2207_v58 = vld [vmem:[%s2979_s1 + $0x5ac] ss:$16 sps:$4 sm:$0xff]  }
  0x78   :  { %1313 = vmatprep.subr.bf16.mxu0 %v2111_v59  ;;  %1442 = vmatprep.subr.bf16.mxu1 %v2114_v60  ;;  %v2202_v59 = vld [vmem:[%s2979_s1 + $0x5a0] ss:$16 sps:$4 sm:$0xff]   ;;  %v2205_v60 = vld [vmem:[%s2979_s1 + $0x5a8] ss:$16 sps:$4 sm:$0xff]  }
  0x7b   :  { %1314 = vmatpush1.bf16.msra.mxu0 %v2109_v61  ;;  %1443 = vmatpush1.bf16.msra.mxu1 %v2112_v62  ;;  %v2210_v61 = vld [vmem:[%s2979_s1 + $0x5c4] ss:$16 sps:$4 sm:$0xff]   ;;  %v2213_v62 = vld [vmem:[%s2979_s1 + $0x5cc] ss:$16 sps:$4 sm:$0xff]  }
  0x7c   :  { %1315 = vmatprep.subr.bf16.mxu0 %v2117_v63  ;;  %1444 = vmatprep.subr.bf16.mxu1 %v2120_v0  ;;  %v2208_v63 = vld [vmem:[%s2979_s1 + $0x5c0] ss:$16 sps:$4 sm:$0xff]   ;;  %v2211_v0 = vld [vmem:[%s2979_s1 + $0x5c8] ss:$16 sps:$4 sm:$0xff]  }
  0x7f   :  { %1316 = vmatpush1.bf16.msra.mxu0 %v2115_v1  ;;  %1445 = vmatpush1.bf16.msra.mxu1 %v2118_v2  ;;  %v2216_v1 = vld [vmem:[%s2979_s1 + $0x5e4] ss:$16 sps:$4 sm:$0xff]   ;;  %v2219_v2 = vld [vmem:[%s2979_s1 + $0x5ec] ss:$16 sps:$4 sm:$0xff]  }
  0x80   :  { %1328 = vmatprep.subr.bf16.mxu0 %v2126_v3  ;;  %1457 = vmatprep.subr.bf16.mxu1 %v2129_v4  ;;  %v2214_v3 = vld [vmem:[%s2979_s1 + $0x5e0] ss:$16 sps:$4 sm:$0xff]   ;;  %v2217_v4 = vld [vmem:[%s2979_s1 + $0x5e8] ss:$16 sps:$4 sm:$0xff]  }
  0x82   :  { %1318 = vmatmul.mubr.bf16.vlgmr.msra.gmra.mrb[0].mxu0 %v2121_v5  ;;  %1447 = vmatmul.mubr.bf16.vlgmr.msra.gmra.mrb[0].mxu1 %v2121_v5  ;;  %v2220_v5 = vld [vmem:[%s2980_s0 + $0x10] ss:$24 sps:$4 sm:$0xff]  }
  0x83   :  { %1329 = vmatpush1.bf16.msra.mxu0 %v2124_v6  ;;  %1458 = vmatpush1.bf16.msra.mxu1 %v2127_v7  ;;  %v2247_v6 = vmov 0   ;;  %v2248_v7 = vmov -inf  }
  0x84   :  { %1330 = vmatprep.subr.bf16.mxu0 %v2132_v8  ;;  %1459 = vmatprep.subr.bf16.mxu1 %v2135_v9  ;;  %24 = vst.msk [vmem:[#allocation2] sm:$0xff] %vm23_vm0, %v2248_v7  ;;  %25 = vst.msk [vmem:[#allocation2 + $0x8] sm:$0xff] %vm23_vm0, %v2248_v7  ;;  %v2249_v8 = vmov 0.0   ;;  %v232_v9 = vlaneseq }
  0x85   :  { %1360 = vmatprep.mubr.bf16.mxu0 %v2222_v10  ;;  %1489 = vmatprep.mubr.bf16.mxu1 %v2222_v10  ;;  %27 = vst.msk [vmem:[#allocation3] sm:$0xff] %vm23_vm0, %v2249_v8  ;;  %28 = vst.msk [vmem:[#allocation3 + $0x8] sm:$0xff] %vm23_vm0, %v2249_v8 }
  0x86   :  { %1925 = vset.pattern.permute.xlu0 %v2247_v6  ;;  %1924 = vset.pattern.permute.xlu1 %v2247_v6  ;;  %30 = vst.msk [vmem:[#allocation4] sm:$0xff] %vm23_vm0, %v2249_v8  ;;  %31 = vst.msk [vmem:[#allocation4 + $0x8] sm:$0xff] %vm23_vm0, %v2249_v8  ;;  %v2879_v10 = vshrl.u32 %v232_v9, 7 }
  0x87   :  { %1331 = vmatpush1.bf16.msra.mxu0 %v2130_v11  ;;  %1460 = vmatpush1.bf16.msra.mxu1 %v2133_v12 }
  0x88   :  { %1332 = vmatprep.subr.bf16.mxu0 %v2138_v13  ;;  %1461 = vmatprep.subr.bf16.mxu1 %v2141_v14  ;;  %v234_v11 = vsub.s32 0, %v2879_v10  ;;  %v242_v12 = vsub.s32 2, %v2879_v10  ;;  %v230_v13 = vld [vmem:[%s2981_s2] sm:$0xf]  ;;  %v238_v14 = vsub.s32 1, %v2879_v10  ;;  %vm1679_vm11 = vcmp.eq.s32.totalorder %v2879_v10, 0 }
  0x8b   :  { %1333 = vmatpush1.bf16.msra.mxu0 %v2136_v15  ;;  %1462 = vmatpush1.bf16.msra.mxu1 %v2139_v16  ;;  %v246_v15 = vsub.s32 3, %v2879_v10  ;;  %v235_v16 = vrot.slane %v230_v13, %v234_v11 }
  0x8c   :  { %1334 = vmatprep.subr.bf16.mxu0 %v2144_v17  ;;  %1463 = vmatprep.subr.bf16.mxu1 %v2147_v18  ;;  %v243_v17 = vrot.slane %v230_v13, %v242_v12  ;;  %v239_v18 = vrot.slane %v230_v13, %v238_v14 }
  0x8f   :  { %1335 = vmatpush1.bf16.msra.mxu0 %v2142_v19  ;;  %1464 = vmatpush1.bf16.msra.mxu1 %v2145_v20  ;;  %v247_v19 = vrot.slane %v230_v13, %v246_v15 }
  0x90   :  { %1336 = vmatprep.subr.bf16.mxu0 %v2150_v21  ;;  %1465 = vmatprep.subr.bf16.mxu1 %v2153_v22 }
  0x93   :  { %1337 = vmatpush1.bf16.msra.mxu0 %v2148_v23  ;;  %1466 = vmatpush1.bf16.msra.mxu1 %v2151_v24 }
  0x94   :  { %1338 = vmatprep.subr.bf16.mxu0 %v2156_v25  ;;  %1467 = vmatprep.subr.bf16.mxu1 %v2159_v26 }
  0x97   :  { %1339 = vmatpush1.bf16.msra.mxu0 %v2154_v27  ;;  %1468 = vmatpush1.bf16.msra.mxu1 %v2157_v28 }
  0x98   :  { %1340 = vmatprep.subr.bf16.mxu0 %v2162_v29  ;;  %1469 = vmatprep.subr.bf16.mxu1 %v2165_v30 }
  0x9b   :  { %1341 = vmatpush1.bf16.msra.mxu0 %v2160_v31  ;;  %1470 = vmatpush1.bf16.msra.mxu1 %v2163_v32 }
  0x9c   :  { %1342 = vmatprep.subr.bf16.mxu0 %v2168_v33  ;;  %1471 = vmatprep.subr.bf16.mxu1 %v2171_v34 }
  0x9f   :  { %1343 = vmatpush1.bf16.msra.mxu0 %v2166_v35  ;;  %1472 = vmatpush1.bf16.msra.mxu1 %v2169_v36 }
  0xa0   :  { %1344 = vmatprep.subr.bf16.mxu0 %v2174_v37  ;;  %1473 = vmatprep.subr.bf16.mxu1 %v2177_v38 }
  0xa3   :  { %1345 = vmatpush1.bf16.msra.mxu0 %v2172_v39  ;;  %1474 = vmatpush1.bf16.msra.mxu1 %v2175_v40 }
  0xa4   :  { %1346 = vmatprep.subr.bf16.mxu0 %v2180_v41  ;;  %1475 = vmatprep.subr.bf16.mxu1 %v2183_v42  ;;  %v2903_v42 = vld [vmem:[%s2982_s3] sm:$0xff] }
  0xa5   :  { %vm1645_vm9 = vcmp.ne.s32.totalorder %v2903_v42, 1 }
  0xa7   :  { %1347 = vmatpush1.bf16.msra.mxu0 %v2178_v43  ;;  %1476 = vmatpush1.bf16.msra.mxu1 %v2181_v44  ;;  %v2906_v43 = vld [vmem:[#allocation2] sm:$0xff] }
  0xa8   :  { %1348 = vmatprep.subr.bf16.mxu0 %v2186_v45  ;;  %1477 = vmatprep.subr.bf16.mxu1 %v2189_v46  ;;  %v2911_v46 = vld [vmem:[#allocation2 + $0x8] sm:$0xff] }
  0xab   :  { %1349 = vmatpush1.bf16.msra.mxu0 %v2184_v47  ;;  %1478 = vmatpush1.bf16.msra.mxu1 %v2187_v48 }
  0xac   :  { %1350 = vmatprep.subr.bf16.mxu0 %v2192_v49  ;;  %1479 = vmatprep.subr.bf16.mxu1 %v2195_v50  ;;  %v2918_v49 = vand.u32 127, %v232_v9 }
  0xae   :  { %vm1682_vm12 = vcmp.eq.s32.totalorder %v2918_v49, 1  ;;  %vm1680_vm13 = vcmp.eq.s32.totalorder %v2918_v49, 0 }
  0xaf   :  { %1351 = vmatpush1.bf16.msra.mxu0 %v2190_v51  ;;  %1480 = vmatpush1.bf16.msra.mxu1 %v2193_v52  ;;  %v2931_v52 = vld [vmem:[%s2982_s3 + $0x8] sm:$0xff]  ;;  %vm1683_vm14 = vmand %vm1679_vm11, %vm1682_vm12 }
  0xb0   :  { %1352 = vmatprep.subr.bf16.mxu0 %v2198_v53  ;;  %1481 = vmatprep.subr.bf16.mxu1 %v2201_v54  ;;  %v1504_v53 = vadd.s32 128, %v2918_v49  ;;  %v2935_v54 = vadd.s32 256, %v2918_v49  ;;  %vm1646_vm10 = vcmp.ne.s32.totalorder %v2931_v52, 1  ;;  %vm1681_vm15 = vmand %vm1679_vm11, %vm1680_vm13 }
  0xb3   :  { %1353 = vmatpush1.bf16.msra.mxu0 %v2196_v55  ;;  %1482 = vmatpush1.bf16.msra.mxu1 %v2199_v56  ;;  %v2939_v55 = vadd.s32 384, %v2918_v49 }
  0xb4   :  { %1354 = vmatprep.subr.bf16.mxu0 %v2204_v57  ;;  %1483 = vmatprep.subr.bf16.mxu1 %v2207_v58 }
  0xb7   :  { %1355 = vmatpush1.bf16.msra.mxu0 %v2202_v59  ;;  %1484 = vmatpush1.bf16.msra.mxu1 %v2205_v60 }
  0xb8   :  { %1356 = vmatprep.subr.bf16.mxu0 %v2210_v61  ;;  %1485 = vmatprep.subr.bf16.mxu1 %v2213_v62 }
  0xbb   :  { %1357 = vmatpush1.bf16.msra.mxu0 %v2208_v63  ;;  %1486 = vmatpush1.bf16.msra.mxu1 %v2211_v0 }
  0xbc   :  { %1358 = vmatprep.subr.bf16.mxu0 %v2216_v1  ;;  %1487 = vmatprep.subr.bf16.mxu1 %v2219_v2 }
  0xbf   :  { %1359 = vmatpush1.bf16.msra.mxu0 %v2214_v3  ;;  %1488 = vmatpush1.bf16.msra.mxu1 %v2217_v4 }
  0xc2   :  { %1361 = vmatmul.mubr.bf16.vlgmr.msra.gmra.mrb[0].mxu0 %v2220_v5  ;;  %1490 = vmatmul.mubr.bf16.vlgmr.msra.gmra.mrb[0].mxu1 %v2220_v5 }
 0x195   :  { %v1362_v20 = vpop.f32.mrb[0].mxu0  ;;  %v1491_v21 = vpop.f32.mrb[0].mxu1 }
 0x196   :  { %v1893_v22 = vadd.f32 %v1362_v20, %v235_v16  ;;  %v1897_v23 = vadd.f32 %v1491_v21, %v243_v17  ;;  %v1364_v24 = vpop.f32.mrb[1].mxu0  ;;  %v1493_v25 = vpop.f32.mrb[1].mxu1 }
 0x197   :  { %v1894_v26 = vadd.f32 %v1364_v24, %v239_v18  ;;  %v1898_v27 = vadd.f32 %v1493_v25, %v247_v19  ;;  %v1366_v28 = vpop.f32.mrb[2].mxu0  ;;  %v1495_v29 = vpop.f32.mrb[2].mxu1 }
 0x198   :  { %v2888_v30 = vadd.f32 %v1366_v28, %v235_v16  ;;  %v2890_v31 = vadd.f32 %v1495_v29, %v243_v17  ;;  %v1368_v32 = vpop.f32.mrb[3].mxu0  ;;  %v1497_v33 = vpop.f32.mrb[3].mxu1  ;;  %v1555_v34 = vmax.f32 %v1893_v22, %v1897_v23 }
 0x199   :  { %v2892_v35 = vadd.f32 %v1368_v32, %v239_v18  ;;  %v2894_v36 = vadd.f32 %v1497_v33, %v247_v19  ;;  %v1556_v37 = vmax.f32 %v1894_v26, %v1898_v27 }
 0x19a   :  { %v1560_v39 = vmax.f32 %v2888_v30, %v2890_v31 }
 0x19b   :  { %v1557_v38 = vmax.f32 %v1555_v34, %v1556_v37  ;;  %v1561_v40 = vmax.f32 %v2892_v35, %v2894_v36 }
 0x19d   :  { %1558 = vmax.xlane.f32.xlu0 %v1557_v38  ;;  %v1562_v41 = vmax.f32 %v1560_v39, %v1561_v40 }
 0x1a1   :  { %1563 = vmax.xlane.f32.xlu0 %v1562_v41 }
 0x1b7   :  { %1516 = vperm.xlu0 %1925, %v2903_v42  }
 0x22a   :  { %v1559_v44 = vpop.xlane.xlu0 %1558 }
 0x22b   :  { %v2909_v45 = vmax.f32 %v2906_v43, %v1559_v44 }
 0x22d   :  { %v1570_v47 = vsub.f32 %v2906_v43, %v2909_v45  ;;  %1626 = vst.msk [vmem:[#allocation2] sm:$0xff] %vm23_vm0, %v2909_v45  ;;  %1580 = vperm.xlu1 %1924, %v2909_v45   ;;  %v1514_v43 = vld [vmem:[#allocation4 + $0x8] sm:$0xff] }
 0x22e   :  { %v1564_v48 = vpop.xlane.xlu0 %1563 }
 0x22f   :  { %v2921_v50 = vmax.f32 %v2911_v46, %v1564_v48 }
 0x231   :  { %v1571_v51 = vsub.f32 %v2911_v46, %v2921_v50  ;;  %1627 = vst.msk [vmem:[#allocation2 + $0x8] sm:$0xff] %vm23_vm0, %v2921_v50  ;;  %1585 = vperm.xlu1 %1924, %v2921_v50  }
 0x235   :  { %1519 = vperm.xlu1 %1924, %v2931_v52  }
 0x236   :  { %v1517_v56 = vpop.permute.xlu0 %1516 }
 0x237   :  { %vm1521_vm1 = vcmp.eq.s32.totalorder %v2918_v49, %v1517_v56  ;;  %vm1522_vm2 = vcmp.eq.s32.totalorder %v1504_v53, %v1517_v56  ;;  %vm1523_vm3 = vcmp.eq.s32.totalorder %v2935_v54, %v1517_v56  ;;  %vm1524_vm4 = vcmp.eq.s32.totalorder %v2939_v55, %v1517_v56 }
 0x238   :  { %v1529_v57 = vsel %vm1521_vm1, %v1893_v22, 0.0  ;;  %v1530_v58 = vsel %vm1522_vm2, %v1894_v26, 0.0  ;;  %v1531_v60 = vsel %vm1523_vm3, %v1897_v23, 0.0  ;;  %v1532_v62 = vsel %vm1524_vm4, %v1898_v27, 0.0 }
 0x239   :  { %v1537_v59 = vadd.f32 %v1530_v58, %v1529_v57  ;;  %v1568_v58 = vld [vmem:[#allocation3] sm:$0xff] }
 0x23b   :  { %v1538_v61 = vadd.f32 %v1537_v59, %v1531_v60 }
 0x23d   :  { %v1539_v63 = vadd.f32 %v1538_v61, %v1532_v62  ;;  %v1569_v61 = vld [vmem:[#allocation3 + $0x8] sm:$0xff] }
 0x23f   :  { %1540 = vadd.xlane.f32.xlu0 %v1539_v63 }
 0x2ac   :  { %v1581_v0 = vpop.permute.xlu1 %1580 }
 0x2ad   :  { %v1588_v1 = vsub.f32 %v1893_v22, %v1581_v0  ;;  %v1589_v2 = vsub.f32 %v1894_v26, %v1581_v0  ;;  %v1590_v3 = vsub.f32 %v1897_v23, %v1581_v0  ;;  %v1591_v4 = vsub.f32 %v1898_v27, %v1581_v0 }
 0x2af   :  { %v1596_v5 = vmul.f32 1.442695, %v1588_v1  ;;  %v1598_v6 = vmul.f32 1.442695, %v1589_v2  ;;  %v1600_v7 = vmul.f32 1.442695, %v1590_v3 }
 0x2b0   :  { %v1602_v9 = vmul.f32 1.442695, %v1591_v4  ;;  %v1586_v11 = vpop.permute.xlu1 %1585  ;;  %v1631_v3 = vld [vmem:[#allocation2] sm:$0xff] }
 0x2b1   :  { %2223 = vpow2.f32 %v1596_v5  ;;  %v1592_v12 = vsub.f32 %v2888_v30, %v1586_v11  ;;  %v1593_v13 = vsub.f32 %v2892_v35, %v1586_v11  ;;  %v1594_v14 = vsub.f32 %v2890_v31, %v1586_v11 }
 0x2b2   :  { %2225 = vpow2.f32 %v1598_v6  ;;  %v1595_v15 = vsub.f32 %v2894_v36, %v1586_v11  ;;  %v1891_v11 = vsel %vm1645_vm9, 1.0, %v2249_v8 }
 0x2b3   :  { %2227 = vpow2.f32 %v1600_v7  ;;  %v1604_v16 = vmul.f32 1.442695, %v1592_v12  ;;  %v1606_v17 = vmul.f32 1.442695, %v1593_v13  ;;  %v1608_v18 = vmul.f32 1.442695, %v1594_v14 }
 0x2b4   :  { %2229 = vpow2.f32 %v1602_v9  ;;  %v1610_v19 = vmul.f32 1.442695, %v1595_v15  ;;  %v1520_v20 = vpop.permute.xlu1 %1519  ;;  %v1632_v12 = vld [vmem:[#allocation2 + $0x8] sm:$0xff]  ;;  %v1892_v14 = vsel %vm1646_vm10, 1.0, %v2249_v8 }
 0x2b5   :  { %2231 = vpow2.f32 %v1604_v16  ;;  %vm1525_vm5 = vcmp.eq.s32.totalorder %v2918_v49, %v1520_v20  ;;  %vm1526_vm6 = vcmp.eq.s32.totalorder %v1504_v53, %v1520_v20  ;;  %vm1527_vm7 = vcmp.eq.s32.totalorder %v2935_v54, %v1520_v20  ;;  %v1513_v53 = vld [vmem:[#allocation4] sm:$0xff] }
 0x2b6   :  { %2233 = vpow2.f32 %v1606_v17  ;;  %v1533_v26 = vsel %vm1525_vm5, %v2888_v30, 0.0  ;;  %v1534_v27 = vsel %vm1526_vm6, %v2892_v35, 0.0  ;;  %v1535_v41 = vsel %vm1527_vm7, %v2890_v31, 0.0 }
 0x2b7   :  { %2235 = vpow2.f32 %v1608_v18  ;;  %v1542_v37 = vadd.f32 %v1534_v27, %v1533_v26  ;;  %vm1528_vm8 = vcmp.eq.s32.totalorder %v2939_v55, %v1520_v20  ;;  %v1572_v54 = vmul.f32 1.442695, %v1570_v47 }
 0x2b8   :  { %2237 = vpow2.f32 %v1610_v19  ;;  %v1536_v35 = vsel %vm1528_vm8, %v2894_v36, 0.0  ;;  %v1574_v31 = vmul.f32 1.442695, %v1571_v51  ;;  %v1665_v20 = vsel %vm23_vm0, %v1891_v11, 0.0 }
 0x2b9   :  { %v1543_v30 = vadd.f32 %v1542_v37, %v1535_v41  ;;  %2239 = vpow2.f32 %v1572_v54  ;;  %v1666_v52 = vsel %vm23_vm0, %v1892_v14, 0.0 }
 0x2ba   :  { %2241 = vpow2.f32 %v1574_v31 }
 0x2bb   :  { %v2224_v21 = vpop.eup %2223  ;;  %v1544_v48 = vadd.f32 %v1543_v30, %v1536_v35 }
 0x2bc   :  { %v2226_v22 = vpop.eup %2225 }
 0x2bd   :  { %v2228_v23 = vpop.eup %2227  ;;  %v1612_v24 = vadd.f32 %v2226_v22, %v2224_v21  ;;  %v1667_v22 = vadd.f32 %v1666_v52, %v1665_v20 }
 0x2be   :  { %v2230_v25 = vpop.eup %2229 }
 0x2bf   :  { %v2232_v28 = vpop.eup %2231  ;;  %v1613_v29 = vadd.f32 %v2228_v23, %v1612_v24 }
 0x2c0   :  { %v2234_v32 = vpop.eup %2233 }
 0x2c1   :  { %v1614_v33 = vadd.f32 %v2230_v25, %v1613_v29  ;;  %v1617_v34 = vadd.f32 %v2234_v32, %v2232_v28  ;;  %v2236_v38 = vpop.eup %2235 }
 0x2c2   :  { %v2238_v40 = vpop.eup %2237 }
 0x2c3   :  { %1615 = vadd.xlane.f32.xlu1 %v1614_v33  ;;  %v1618_v39 = vadd.f32 %v2236_v38, %v1617_v34  ;;  %v2240_v55 = vpop.eup %2239 }
 0x2c4   :  { %v1576_v36 = vmul.f32 %v2240_v55, %v1568_v58  ;;  %v2242_v59 = vpop.eup %2241 }
 0x2c5   :  { %v1619_v44 = vadd.f32 %v2238_v40, %v1618_v39  ;;  %v1577_v63 = vmul.f32 %v2242_v59, %v1569_v61 }
 0x2c7   :  { %1620 = vadd.xlane.f32.xlu1 %v1619_v44 }
 0x2cb   :  { %1545 = vadd.xlane.f32.xlu1 %v1544_v48 }
 0x2cc   :  { %v1541_v56 = vpop.xlane.xlu0 %1540 }
 0x2cd   :  { %v1547_v57 = vadd.f32 %v1541_v56, %v1513_v53 }
 0x2cf   :  { %1550 = vst.msk [vmem:[#allocation4] sm:$0xff] %vm23_vm0, %v1547_v57 }
 0x2d6   :  { %v1641_v6 = vld [vmem:[#allocation4] sm:$0xff] }
 0x350   :  { %v1616_v60 = vpop.xlane.xlu1 %1615 }
 0x351   :  { %v1622_v62 = vadd.f32 %v1616_v60, %v1576_v36 }
 0x353   :  { %1624 = vst.msk [vmem:[#allocation3] sm:$0xff] %vm23_vm0, %v1622_v62 }
 0x354   :  { %v1621_v0 = vpop.xlane.xlu1 %1620 }
 0x355   :  { %v1623_v1 = vadd.f32 %v1621_v0, %v1577_v63 }
 0x357   :  { %1625 = vst.msk [vmem:[#allocation3 + $0x8] sm:$0xff] %vm23_vm0, %v1623_v1 }
 0x358   :  { %v1546_v45 = vpop.xlane.xlu1 %1545 }
 0x359   :  { %v1548_v47 = vadd.f32 %v1546_v45, %v1514_v43 }
 0x35a   :  { %v1633_v46 = vld [vmem:[#allocation3] sm:$0xff] }
 0x35b   :  { %1551 = vst.msk [vmem:[#allocation4 + $0x8] sm:$0xff] %vm23_vm0, %v1548_v47  ;;  %2243 = vlog2.f32 %v1633_v46 }
 0x35e   :  { %v1634_v50 = vld [vmem:[#allocation3 + $0x8] sm:$0xff] }
 0x35f   :  { %2245 = vlog2.f32 %v1634_v50 }
 0x362   :  { %v1642_v15 = vld [vmem:[#allocation4 + $0x8] sm:$0xff] }
 0x365   :  { %v2244_v51 = vpop.eup %2243 }
 0x366   :  { %v1636_v2 = vmul.f32 0.6931472, %v2244_v51 }
 0x368   :  { %v1639_v4 = vadd.f32 %v1636_v2, %v1631_v3 }
 0x369   :  { %v2246_v5 = vpop.eup %2245 }
 0x36a   :  { %v1638_v7 = vmul.f32 0.6931472, %v2246_v5  ;;  %v1643_v9 = vsub.f32 %v1639_v4, %v1641_v6 }
 0x36c   :  { %v1640_v13 = vadd.f32 %v1638_v7, %v1632_v12  ;;  %v1651_v17 = vmul.f32 %v1891_v11, %v1643_v9 }
 0x36e   :  { %v1644_v16 = vsub.f32 %v1640_v13, %v1642_v15  ;;  %v1653_v19 = vsel %vm23_vm0, %v1651_v17, 0.0 }
 0x370   :  { %v1652_v18 = vmul.f32 %v1892_v14, %v1644_v16 }
 0x372   :  { %v1654_v42 = vsel %vm23_vm0, %v1652_v18, 0.0 }
 0x373   :  { %v1655_v21 = vadd.f32 %v1654_v42, %v1653_v19 }
 0x375   :  { %1656 = vadd.xlane.f32.xlu1 %v1655_v21 }
 0x379   :  { %1668 = vadd.xlane.f32.xlu1 %v1667_v22 }
 0x402   :  { %v1657_v23 = vpop.xlane.xlu1 %1656 }
 0x403   :  { %v1658_v24 = vrot.slane %v1657_v23, 4 }
 0x405   :  { %v1659_v25 = vadd.f32 %v1658_v24, %v1657_v23 }
 0x406   :  { %v1669_v8 = vpop.xlane.xlu1 %1668 }
 0x407   :  { %v1660_v26 = vrot.slane %v1659_v25, 2  ;;  %v1670_v27 = vrot.slane %v1669_v8, 4 }
 0x409   :  { %v1671_v28 = vadd.f32 %v1670_v27, %v1669_v8  ;;  %v1661_v29 = vadd.f32 %v1660_v26, %v1659_v25 }
 0x40b   :  { %v1672_v32 = vrot.slane %v1671_v28, 2  ;;  %v1662_v33 = vrot.slane %v1661_v29, 1 }
 0x40d   :  { %v1673_v34 = vadd.f32 %v1672_v32, %v1671_v28  ;;  %v1663_v37 = vadd.f32 %v1662_v33, %v1661_v29 }
 0x40f   :  { %1917 = vpush %v1663_v37  ;;  %v1674_v38 = vrot.slane %v1673_v34, 1 }
 0x411   :  { %v1675_v39 = vadd.f32 %v1674_v38, %v1673_v34 }
 0x413   :  { %1919 = vpush %v1675_v39 }
 0x440   :  { %s1918_s3 = spop %1917 }
 0x441   :  { %v1686_v41 = vstv %s1918_s3 }
 0x444   :  { %s1920_s24 = spop %1919 }
 0x445   :  { %v1684_v40 = vstv %s1920_s24 }
 0x446   :  { %v1685_v44 = vsel %vm1683_vm14, %v1684_v40, 0.0 }
 0x447   :  { %v1687_v30 = vsel %vm1681_vm15, %v1686_v41, %v1685_v44 }
 0x448   :  { %1688 = vst [vmem:[%s2983_s4] sm:$0xff] %v1687_v30 }

</bundles_post_ra>
